<compile_context>
chip_gen: v6e
topology: v6e:2x2x1
jax: 0.10.0
libtpu: 0.0.40
codegen_flags: <defaults>
</compile_context>

<pallas_src>
import math
from functools import lru_cache, partial

import jax
import jax.numpy as jnp
from jax.experimental import pallas as pl
from jax.experimental.pallas import tpu as pltpu

NEG_SLOPE = 0.2
PIXNORM_EPS = 1e-8
COMPUTE_DTYPE = jnp.bfloat16      # MXU input / inter-layer activation / RGB dtype


def _leaky(v):
    return jnp.where(v >= 0, v, NEG_SLOPE * v)


@lru_cache(maxsize=None)
def _vmem_limit():
    """Generation-aware scoped-VMEM limit (~96 MiB v5e/v6e, ~48 MiB v7x)."""
    try:
        phys = int(pltpu.get_tpu_info().vmem_capacity_bytes)
    except Exception:
        phys = 64 * 1024 * 1024
    return min(int(phys * 3 // 4), 96 * 1024 * 1024)


# ---------------------------------------------------------------------------
# In-kernel helpers
# ---------------------------------------------------------------------------
def _conv3x3_lrelu_pixnorm(pad_ref, w_ref, b_ref, *, TH, Wout, Cin, Cout):
    """9-tap 3x3 conv (bf16 MXU, f32 accumulation) + bias + LeakyReLU(0.2)
    + PixelwiseNorm over a zero-padded (TH+2, Wout+2, Cin) VMEM tile.
    Returns the normalized activation as (TH*Wout, Cout) f32."""
    P = TH * Wout
    acc = jnp.zeros((P, Cout), jnp.float32)
    for dx in range(3):
        # one W-shifted view per dx; the dy taps are contiguous row ranges of it
        xs = pad_ref[:, dx:dx + Wout, :].reshape((TH + 2) * Wout, Cin)
        for dy in range(3):
            patch = xs[dy * Wout:dy * Wout + P, :]
            acc = acc + jnp.dot(patch, w_ref[dy, dx],
                                preferred_element_type=jnp.float32)
    acc = _leaky(acc + b_ref[...])
    inv = jax.lax.rsqrt(jnp.mean(acc * acc, axis=-1, keepdims=True) + PIXNORM_EPS)
    return acc * inv


def _fused_rgb(yn_f32, wrgb_ref, brgb_ref):
    """Fused to_rgb 1x1 conv, emitted lane-dense as (3, P)."""
    rgb = jax.lax.dot_general(wrgb_ref[...], yn_f32.astype(COMPUTE_DTYPE),
                              (((1,), (1,)), ((), ())),
                              preferred_element_type=jnp.float32)
    return rgb + brgb_ref[...]


def _dup_cols(v, Win, Cin):
    """Nearest-neighbour 2x column duplication: (..., Win, Cin) -> (..., 2*Win, Cin).
    Single broadcast + leading/sublane-merging reshape; no per-column stores."""
    rows = v.shape[0]
    v = jnp.broadcast_to(v[:, :, None, :], (rows, Win, 2, Cin))
    return v.reshape(rows, 2 * Win, Cin)


# ---------------------------------------------------------------------------
# Kernels
# ---------------------------------------------------------------------------
def _initial_block_kernel(x_ref, w1_ref, b1_ref, w2_ref, b2_ref,
                          wrgb_ref, brgb_ref, y_ref, rgb_ref, pad_ref, *, L):
    n = pl.program_id(0)
    x = x_ref[pl.ds(n, 1), :].astype(COMPUTE_DTYPE)              # (1, L)
    # 4x4 equalized "deconv" from a 1x1 latent == one (1,L)x(L,16L) matmul.
    y0 = jnp.dot(x, w1_ref[...], preferred_element_type=jnp.float32)   # (1, 16L)
    y0 = _leaky(y0 + b1_ref[...])
    # stage the 4x4 map straight into the zero-padded scratch of the 3x3 conv
    pad_ref[...] = jnp.zeros((6, 6, L), COMPUTE_DTYPE)
    for p in range(16):
        h, w = divmod(p, 4)
        pad_ref[1 + h, 1 + w:2 + w, :] = y0[:, p * L:(p + 1) * L].astype(COMPUTE_DTYPE)
    yn = _conv3x3_lrelu_pixnorm(pad_ref, w2_ref, b2_ref,
                                TH=4, Wout=4, Cin=L, Cout=L)
    y_ref[...] = yn.reshape(1, 4, 4, L).astype(y_ref.dtype)
    rgb_ref[...] = _fused_rgb(yn, wrgb_ref, brgb_ref)[None].astype(rgb_ref.dtype)


def _fused_block_kernel(x_ref, w1_ref, b1_ref, w2_ref, b2_ref, wrgb_ref, brgb_ref,
                        y_ref, rgb_ref, pad1_ref, pad2_ref, *,
                        Hin, Win, Cin, Cmid, Cout, TH, Wout, Hout):
    """One GenGeneralConvBlock row-tile:
       nearest-2x upsample -> conv3x3+lrelu+pixnorm (w/ 1-row halo recompute)
       -> conv3x3+lrelu+pixnorm -> to_rgb.  Nothing intermediate touches HBM."""
    t = pl.program_id(1)
    r0 = t * TH                       # first output row of this tile (TH even)
    m0 = r0 // 2                      # first low-res input row of the tile core
    th_lo = TH // 2

    # ---- upsampled, zero-padded conv1 input: rows r0-2 .. r0+TH+1 ----------
    zcol1 = jnp.zeros((TH + 4, 1, Cin), COMPUTE_DTYPE)
    pad1_ref[:, 0:1, :] = zcol1
    pad1_ref[:, Wout + 1:Wout + 2, :] = zcol1

    core = x_ref[0, pl.ds(m0, th_lo), :, :]                       # (TH/2, Win, C)
    core = jnp.broadcast_to(core[:, None, :, :],
                            (th_lo, 2, Win, Cin)).reshape(TH, Win, Cin)
    pad1_ref[2:TH + 2, 1:Wout + 1, :] = _dup_cols(core, Win, Cin)

    # 2-row top / bottom halos (both halo rows map to the same low-res row)
    top = x_ref[0, pl.ds(jnp.maximum(m0 - 1, 0), 1), :, :]
    top = jnp.where(r0 > 0, top, jnp.zeros_like(top))
    top = _dup_cols(top, Win, Cin)
    pad1_ref[0:1, 1:Wout + 1, :] = top
    pad1_ref[1:2, 1:Wout + 1, :] = top

    bot = x_ref[0, pl.ds(jnp.minimum(m0 + th_lo, Hin - 1), 1), :, :]
    bot = jnp.where(r0 + TH < Hout, bot, jnp.zeros_like(bot))
    bot = _dup_cols(bot, Win, Cin)
    pad1_ref[TH + 2:TH + 3, 1:Wout + 1, :] = bot
    pad1_ref[TH + 3:TH + 4, 1:Wout + 1, :] = bot

    # ---- conv1 (+1 halo row each side) -> lrelu -> pixel norm --------------
    yn1 = _conv3x3_lrelu_pixnorm(pad1_ref, w1_ref, b1_ref,
                                 TH=TH + 2, Wout=Wout, Cin=Cin, Cout=Cmid)

    # ---- stage into the zero-padded conv2 input (rows r0-1 .. r0+TH) -------
    zcol2 = jnp.zeros((TH + 2, 1, Cmid), COMPUTE_DTYPE)
    pad2_ref[:, 0:1, :] = zcol2
    pad2_ref[:, Wout + 1:Wout + 2, :] = zcol2
    pad2_ref[:, 1:Wout + 1, :] = yn1.reshape(TH + 2, Wout, Cmid).astype(COMPUTE_DTYPE)

    zrow2 = jnp.zeros((1, Wout + 2, Cmid), COMPUTE_DTYPE)

    @pl.when(r0 == 0)
    def _():                          # image top: conv2's halo row is zero padding
        pad2_ref[0:1, :, :] = zrow2

    @pl.when(r0 + TH == Hout)
    def _():                          # image bottom
        pad2_ref[TH + 1:TH + 2, :, :] = zrow2

    # ---- conv2 -> lrelu -> pixel norm -> to_rgb -----------------------------
    yn2 = _conv3x3_lrelu_pixnorm(pad2_ref, w2_ref, b2_ref,
                                 TH=TH, Wout=Wout, Cin=Cmid, Cout=Cout)
    y_ref[...] = yn2.reshape(1, TH, Wout, Cout).astype(y_ref.dtype)
    rgb_ref[...] = _fused_rgb(yn2, wrgb_ref, brgb_ref)[None].astype(rgb_ref.dtype)


# ---------------------------------------------------------------------------
# Python wrappers (pallas_call plumbing)
# ---------------------------------------------------------------------------
def _pick_tile_rows(Hout, Wout, Cin, Cmid, Cout, Hin, Win, max_rows=None):
    """Largest even row tile dividing Hout whose working set fits the VMEM
    budget and keeps the flat RGB output block lane-aligned."""
    limit = _vmem_limit()
    fixed = (2 * Hin * Win * Cin * 2                      # resident input, x2 buffers
             + 2 * 9 * (Cin * Cmid + Cmid * Cout) * 2)    # both weight blocks, x2
    budget = max(limit // 2 - fixed, 256 * 1024)

    def tile_bytes(th):
        pads = ((th + 4) * (Wout + 2) * Cin + (th + 2) * (Wout + 2) * Cmid) * 2
        acts = ((th + 2) * Wout * Cmid + th * Wout * Cout) * 4 * 2   # f32 temps + fudge
        outs = 2 * (th * Wout * Cout + 3 * th * Wout) * 2            # y + rgb, x2 buffers
        return pads + acts + outs

    def valid(th):
        return (th >= 2 and th % 2 == 0 and Hout % th == 0
                and (th == Hout or (th * Wout) % 128 == 0))

    th = Hout
    while max_rows is not None and th > max_rows and valid(th // 2):
        th //= 2
    while tile_bytes(th) > budget and valid(th // 2):
        th //= 2
    return th


def _initial_block(x, ip, rgbp):
    N = x.shape[0]
    L = ip['w2'].shape[-1]
    kern = partial(_initial_block_kernel, L=L)
    y, rgb = pl.pallas_call(
        kern,
        grid=(N,),
        in_specs=[
            pl.BlockSpec((N, L), lambda n: (0, 0)),
            pl.BlockSpec((L, 16 * L), lambda n: (0, 0)),
            pl.BlockSpec((1, 16 * L), lambda n: (0, 0)),
            pl.BlockSpec((3, 3, L, L), lambda n: (0, 0, 0, 0)),
            pl.BlockSpec((1, L), lambda n: (0, 0)),
            pl.BlockSpec((3, L), lambda n: (0, 0)),
            pl.BlockSpec((3, 1), lambda n: (0, 0)),
        ],
        out_specs=[
            pl.BlockSpec((1, 4, 4, L), lambda n: (n, 0, 0, 0)),
            pl.BlockSpec((1, 3, 16), lambda n: (n, 0, 0)),
        ],
        out_shape=[
            jax.ShapeDtypeStruct((N, 4, 4, L), COMPUTE_DTYPE),
            jax.ShapeDtypeStruct((N, 3, 16), COMPUTE_DTYPE),
        ],
        scratch_shapes=[pltpu.VMEM((6, 6, L), COMPUTE_DTYPE)],
        compiler_params=pltpu.CompilerParams(
            dimension_semantics=("parallel",),
            vmem_limit_bytes=_vmem_limit()),
    )(x, ip['w1'], ip['b1'], ip['w2'], ip['b2'], rgbp['w'], rgbp['b'])
    return y, rgb


def _gen_block(x, bp, rgbp, *, max_tile_rows=None):
    """One fused GenGeneralConvBlock + to_rgb as a single pallas_call."""
    N, Hin, Win, Cin = x.shape
    Cmid = bp['w1'].shape[-1]
    Cout = bp['w2'].shape[-1]
    Hout, Wout = 2 * Hin, 2 * Win
    TH = _pick_tile_rows(Hout, Wout, Cin, Cmid, Cout, Hin, Win, max_tile_rows)
    n_tiles = Hout // TH

    kern = partial(_fused_block_kernel, Hin=Hin, Win=Win, Cin=Cin, Cmid=Cmid,
                   Cout=Cout, TH=TH, Wout=Wout, Hout=Hout)
    y, rgb = pl.pallas_call(
        kern,
        grid=(N, n_tiles),
        in_specs=[
            pl.BlockSpec((1, Hin, Win, Cin), lambda n, t: (n, 0, 0, 0)),
            pl.BlockSpec((3, 3, Cin, Cmid), lambda n, t: (0, 0, 0, 0)),
            pl.BlockSpec((1, Cmid), lambda n, t: (0, 0)),
            pl.BlockSpec((3, 3, Cmid, Cout), lambda n, t: (0, 0, 0, 0)),
            pl.BlockSpec((1, Cout), lambda n, t: (0, 0)),
            pl.BlockSpec((3, Cout), lambda n, t: (0, 0)),
            pl.BlockSpec((3, 1), lambda n, t: (0, 0)),
        ],
        out_specs=[
            pl.BlockSpec((1, TH, Wout, Cout), lambda n, t: (n, t, 0, 0)),
            pl.BlockSpec((1, 3, TH * Wout), lambda n, t: (n, 0, t)),
        ],
        out_shape=[
            jax.ShapeDtypeStruct((N, Hout, Wout, Cout), COMPUTE_DTYPE),
            jax.ShapeDtypeStruct((N, 3, Hout * Wout), COMPUTE_DTYPE),
        ],
        scratch_shapes=[
            pltpu.VMEM((TH + 4, Wout + 2, Cin), COMPUTE_DTYPE),
            pltpu.VMEM((TH + 2, Wout + 2, Cmid), COMPUTE_DTYPE),
        ],
        compiler_params=pltpu.CompilerParams(
            dimension_semantics=("parallel", "parallel"),
            vmem_limit_bytes=_vmem_limit()),
    )(x, bp['w1'], bp['b1'], bp['w2'], bp['b2'], rgbp['w'], rgbp['b'])
    return y, rgb


# ---------------------------------------------------------------------------
# Parameter construction (deterministic, equalized-LR scale baked in)
# ---------------------------------------------------------------------------
def init_params(key, depth, latent_size):
    L = latent_size
    keys = iter(jax.random.split(key, 4 * depth + 8))
    bf16 = jnp.bfloat16

    # GenInitialBlock: 4x4 equalized transposed conv (fan_in = c_in) as one matmul
    w_deconv = (jax.random.normal(next(keys), (L, 16, L), jnp.float32)
                * math.sqrt(2.0 / L))                        # (ci, p=(h*4+w), co)
    w2 = (jax.random.normal(next(keys), (3, 3, L, L), jnp.float32)
          * math.sqrt(2.0 / (L * 9))).astype(bf16)
    params = {'init': dict(
        w1=w_deconv.reshape(L, 16 * L).astype(bf16),
        b1=jnp.zeros((1, 16 * L), jnp.float32),
        w2=w2,
        b2=jnp.zeros((1, L), jnp.float32),
    )}

    # channel schedule from the PyTorch constructor
    block_io = []
    for i in range(depth - 1):
        if i <= 2:
            cin, cout = L, L
        else:
            cin = int(L // (2 ** (i - 3)))
            cout = int(L // (2 ** (i - 2)))
        block_io.append((cin, cout))
    rgb_in = [L] + [co for (_, co) in block_io]

    blocks = []
    for (cin, cout) in block_io:
        bw1 = (jax.random.normal(next(keys), (3, 3, cin, cout), jnp.float32)
               * math.sqrt(2.0 / (cin * 9))).astype(bf16)
        bw2 = (jax.random.normal(next(keys), (3, 3, cout, cout), jnp.float32)
               * math.sqrt(2.0 / (cout * 9))).astype(bf16)
        blocks.append(dict(w1=bw1, b1=jnp.zeros((1, cout), jnp.float32),
                           w2=bw2, b2=jnp.zeros((1, cout), jnp.float32)))
    params['blocks'] = blocks

    rgbs = []
    for cin in rgb_in:
        w = (jax.random.normal(next(keys), (3, cin), jnp.float32)
             * math.sqrt(2.0 / cin)).astype(bf16)            # (out=3, in)
        rgbs.append(dict(w=w, b=jnp.zeros((3, 1), jnp.float32)))
    params['rgb'] = rgbs
    return params


# ---------------------------------------------------------------------------
# Generator forward (Pallas path).  Outputs are NCHW like the PyTorch module.
# ---------------------------------------------------------------------------
def generator_forward(x, params, depth, *, max_tile_rows=None):
    N = x.shape[0]
    outputs = []
    y, rgb = _initial_block(x, params['init'], params['rgb'][0])
    outputs.append(rgb.reshape(N, 3, 4, 4))
    for i in range(depth - 1):
        y, rgb = _gen_block(y, params['blocks'][i], params['rgb'][i + 1],
                            max_tile_rows=max_tile_rows)
        H, W = y.shape[1], y.shape[2]
        outputs.append(rgb.reshape(N, 3, H, W))
    return outputs


# ---------------------------------------------------------------------------
# Pure-JAX f32 reference (independent lowering through lax.conv)
# ---------------------------------------------------------------------------
def ref_forward(x, params, depth):
    f32 = jnp.float32

    def lrelu(v):
        return jnp.where(v >= 0, v, NEG_SLOPE * v)

    def pixnorm(v):
        return v * jax.lax.rsqrt(jnp.mean(v * v, axis=-1, keepdims=True) + PIXNORM_EPS)

    def conv3(v, w, b):
        y = jax.lax.conv_general_dilated(
            v, w.astype(f32), (1, 1), [(1, 1), (1, 1)],
            dimension_numbers=('NHWC', 'HWIO', 'NHWC'))
        return y + b.astype(f32)

    def to_rgb(v, w, b):
        y = jnp.einsum('nhwc,oc->nhwo', v, w.astype(f32)) + b.astype(f32).reshape(3)
        return jnp.transpose(y, (0, 3, 1, 2))            # NCHW

    ip = params['init']
    N = x.shape[0]
    L = ip['w2'].shape[-1]
    y0 = x @ ip['w1'].astype(f32) + ip['b1'].astype(f32)
    y = lrelu(y0).reshape(N, 4, 4, L)
    y = pixnorm(lrelu(conv3(y, ip['w2'], ip['b2'])))
    outs = [to_rgb(y, params['rgb'][0]['w'], params['rgb'][0]['b'])]
    for i in range(depth - 1):
        bp = params['blocks'][i]
        y = jnp.repeat(jnp.repeat(y, 2, axis=1), 2, axis=2)   # nearest 2x upsample
        y = pixnorm(lrelu(conv3(y, bp['w1'], bp['b1'])))
        y = pixnorm(lrelu(conv3(y, bp['w2'], bp['b2'])))
        outs.append(to_rgb(y, params['rgb'][i + 1]['w'], params['rgb'][i + 1]['b']))
    return outs


if __name__ == "__main__":
    depth, latent_size, batch = 5, 16, 2   # exercises both channel branches
    key = jax.random.PRNGKey(0)
    pkey, xkey = jax.random.split(key)
    params = init_params(pkey, depth, latent_size)
    x = jax.random.normal(xkey, (batch, latent_size), jnp.float32)

    refs = ref_forward(x, params, depth)

    # Run once with default tiling (single row tile per scale at these sizes)
    # and once with small forced tiles to exercise the halo / multi-tile path.
    for max_rows in (None, 8):
        outs = jax.block_until_ready(
            generator_forward(x, params, depth, max_tile_rows=max_rows))
        for s, (o, r) in enumerate(zip(outs, refs)):
            expected = (batch, 3, 4 * (2 ** s), 4 * (2 ** s))
            assert o.shape == expected, (o.shape, expected)
            # bf16 MXU inputs + bf16 activations/RGB -> loose relative check
            rel = float(jnp.max(jnp.abs(o.astype(jnp.float32) - r))
                        / (jnp.max(jnp.abs(r)) + 1e-6))
            assert rel < 0.1, f"scale {s} (max_rows={max_rows}): rel err {rel}"

    print("KERNEL_OK")
</pallas_src>

<mosaic_0001>
module attributes {stable_mosaic.version = 11 : i64} {
  func.func @_initial_block_kernel(%arg0: i32, %arg1: memref<2x16xf32, #tpu.memory_space<vmem>>, %arg2: memref<16x256xbf16, #tpu.memory_space<vmem>>, %arg3: memref<1x256xf32, #tpu.memory_space<vmem>>, %arg4: memref<3x3x16x16xbf16, #tpu.memory_space<vmem>>, %arg5: memref<1x16xf32, #tpu.memory_space<vmem>>, %arg6: memref<3x16xbf16, #tpu.memory_space<vmem>>, %arg7: memref<3x1xf32, #tpu.memory_space<vmem>>, %arg8: memref<1x4x4x16xbf16, #tpu.memory_space<vmem>>, %arg9: memref<1x3x16xbf16, #tpu.memory_space<vmem>>, %arg10: memref<6x6x16xbf16, #tpu.memory_space<vmem>>) attributes {dimension_semantics = [#tpu.dimension_semantics<parallel>], iteration_bounds = array<i64: 2>, scalar_prefetch = 0 : i64, scratch_operands = 1 : i64, tpu.core_type = #tpu.core_type<tc>, window_params = [{pipeline_mode = #tpu.pipeline_mode<synchronous>, transform_indices = @transform_0, window_bounds = array<i64: 2, 16>}, {pipeline_mode = #tpu.pipeline_mode<synchronous>, transform_indices = @transform_1, window_bounds = array<i64: 16, 256>}, {pipeline_mode = #tpu.pipeline_mode<synchronous>, transform_indices = @transform_2, window_bounds = array<i64: 1, 256>}, {pipeline_mode = #tpu.pipeline_mode<synchronous>, transform_indices = @transform_3, window_bounds = array<i64: 3, 3, 16, 16>}, {pipeline_mode = #tpu.pipeline_mode<synchronous>, transform_indices = @transform_4, window_bounds = array<i64: 1, 16>}, {pipeline_mode = #tpu.pipeline_mode<synchronous>, transform_indices = @transform_5, window_bounds = array<i64: 3, 16>}, {pipeline_mode = #tpu.pipeline_mode<synchronous>, transform_indices = @transform_6, window_bounds = array<i64: 3, 1>}, {transform_indices = @transform_7, window_bounds = array<i64: 1, 4, 4, 16>}, {transform_indices = @transform_8, window_bounds = array<i64: 1, 3, 16>}]} {
    %0 = arith.index_cast %arg0 : i32 to index
    %c0 = arith.constant 0 : index
    %1 = vector.load %arg1[%0, %c0] : memref<2x16xf32, #tpu.memory_space<vmem>>, vector<1x16xf32>
    %2 = arith.truncf %1 : vector<1x16xf32> to vector<1x16xbf16>
    %c0_0 = arith.constant 0 : index
    %c0_1 = arith.constant 0 : index
    %3 = vector.load %arg2[%c0_0, %c0_1] : memref<16x256xbf16, #tpu.memory_space<vmem>>, vector<16x256xbf16>
    %cst = arith.constant dense<0.000000e+00> : vector<1x256xf32>
    %4 = tpu.matmul %2, %3, %cst {dimension_numbers = #tpu.dot_dimension_numbers<[1], [0], [0], [1], [0, 0, 1, 1], [], []>} : vector<1x16xbf16>, vector<16x256xbf16>, vector<1x256xf32> -> vector<1x256xf32>
    %c0_2 = arith.constant 0 : index
    %c0_3 = arith.constant 0 : index
    %5 = vector.load %arg3[%c0_2, %c0_3] : memref<1x256xf32, #tpu.memory_space<vmem>>, vector<1x256xf32>
    %6 = arith.addf %4, %5 : vector<1x256xf32>
    %cst_4 = arith.constant 0.000000e+00 : f32
    %7 = vector.broadcast %cst_4 : f32 to vector<1x256xf32>
    %8 = arith.cmpf oge, %6, %7 : vector<1x256xf32>
    %cst_5 = arith.constant 2.000000e-01 : f32
    %9 = vector.broadcast %cst_5 : f32 to vector<1x256xf32>
    %10 = arith.mulf %9, %6 : vector<1x256xf32>
    %11 = arith.select %8, %6, %10 : vector<1x256xi1>, vector<1x256xf32>
    %cst_6 = arith.constant 0.000000e+00 : bf16
    %12 = vector.broadcast %cst_6 : bf16 to vector<6x6x16xbf16>
    %c0_7 = arith.constant 0 : index
    %c0_8 = arith.constant 0 : index
    %c0_9 = arith.constant 0 : index
    %13 = vector.load %arg10[%c0_7, %c0_8, %c0_9] : memref<6x6x16xbf16, #tpu.memory_space<vmem>>, vector<6x6x16xbf16>
    tpu.vector_store %arg10[%c0_7, %c0_8, %c0_9], %12 {strides = array<i32>} : memref<6x6x16xbf16, #tpu.memory_space<vmem>>, vector<6x6x16xbf16>,
    %14 = vector.extract_strided_slice %11 {offsets = [0, 0], sizes = [1, 16], strides = [1, 1]} : vector<1x256xf32> to vector<1x16xf32>
    %15 = arith.truncf %14 : vector<1x16xf32> to vector<1x16xbf16>
    %c1 = arith.constant 1 : index
    %c1_10 = arith.constant 1 : index
    %c0_11 = arith.constant 0 : index
    %16 = vector.load %arg10[%c1, %c1_10, %c0_11] : memref<6x6x16xbf16, #tpu.memory_space<vmem>>, vector<1x1x16xbf16>
    %17 = vector.shape_cast %16 : vector<1x1x16xbf16> to vector<1x16xbf16>
    %18 = vector.shape_cast %15 : vector<1x16xbf16> to vector<1x1x16xbf16>
    tpu.vector_store %arg10[%c1, %c1_10, %c0_11], %18 {strides = array<i32>} : memref<6x6x16xbf16, #tpu.memory_space<vmem>>, vector<1x1x16xbf16>,
    %19 = vector.extract_strided_slice %11 {offsets = [0, 16], sizes = [1, 16], strides = [1, 1]} : vector<1x256xf32> to vector<1x16xf32>
    %20 = arith.truncf %19 : vector<1x16xf32> to vector<1x16xbf16>
    %c1_12 = arith.constant 1 : index
    %c2 = arith.constant 2 : index
    %c0_13 = arith.constant 0 : index
    %21 = vector.load %arg10[%c1_12, %c2, %c0_13] : memref<6x6x16xbf16, #tpu.memory_space<vmem>>, vector<1x1x16xbf16>
    %22 = vector.shape_cast %21 : vector<1x1x16xbf16> to vector<1x16xbf16>
    %23 = vector.shape_cast %20 : vector<1x16xbf16> to vector<1x1x16xbf16>
    tpu.vector_store %arg10[%c1_12, %c2, %c0_13], %23 {strides = array<i32>} : memref<6x6x16xbf16, #tpu.memory_space<vmem>>, vector<1x1x16xbf16>,
    %24 = vector.extract_strided_slice %11 {offsets = [0, 32], sizes = [1, 16], strides = [1, 1]} : vector<1x256xf32> to vector<1x16xf32>
    %25 = arith.truncf %24 : vector<1x16xf32> to vector<1x16xbf16>
    %c1_14 = arith.constant 1 : index
    %c3 = arith.constant 3 : index
    %c0_15 = arith.constant 0 : index
    %26 = vector.load %arg10[%c1_14, %c3, %c0_15] : memref<6x6x16xbf16, #tpu.memory_space<vmem>>, vector<1x1x16xbf16>
    %27 = vector.shape_cast %26 : vector<1x1x16xbf16> to vector<1x16xbf16>
    %28 = vector.shape_cast %25 : vector<1x16xbf16> to vector<1x1x16xbf16>
    tpu.vector_store %arg10[%c1_14, %c3, %c0_15], %28 {strides = array<i32>} : memref<6x6x16xbf16, #tpu.memory_space<vmem>>, vector<1x1x16xbf16>,
    %29 = vector.extract_strided_slice %11 {offsets = [0, 48], sizes = [1, 16], strides = [1, 1]} : vector<1x256xf32> to vector<1x16xf32>
    %30 = arith.truncf %29 : vector<1x16xf32> to vector<1x16xbf16>
    %c1_16 = arith.constant 1 : index
    %c4 = arith.constant 4 : index
    %c0_17 = arith.constant 0 : index
    %31 = vector.load %arg10[%c1_16, %c4, %c0_17] : memref<6x6x16xbf16, #tpu.memory_space<vmem>>, vector<1x1x16xbf16>
    %32 = vector.shape_cast %31 : vector<1x1x16xbf16> to vector<1x16xbf16>
    %33 = vector.shape_cast %30 : vector<1x16xbf16> to vector<1x1x16xbf16>
    tpu.vector_store %arg10[%c1_16, %c4, %c0_17], %33 {strides = array<i32>} : memref<6x6x16xbf16, #tpu.memory_space<vmem>>, vector<1x1x16xbf16>,
    %34 = vector.extract_strided_slice %11 {offsets = [0, 64], sizes = [1, 16], strides = [1, 1]} : vector<1x256xf32> to vector<1x16xf32>
    %35 = arith.truncf %34 : vector<1x16xf32> to vector<1x16xbf16>
    %c2_18 = arith.constant 2 : index
    %c1_19 = arith.constant 1 : index
    %c0_20 = arith.constant 0 : index
    %36 = vector.load %arg10[%c2_18, %c1_19, %c0_20] : memref<6x6x16xbf16, #tpu.memory_space<vmem>>, vector<1x1x16xbf16>
    %37 = vector.shape_cast %36 : vector<1x1x16xbf16> to vector<1x16xbf16>
    %38 = vector.shape_cast %35 : vector<1x16xbf16> to vector<1x1x16xbf16>
    tpu.vector_store %arg10[%c2_18, %c1_19, %c0_20], %38 {strides = array<i32>} : memref<6x6x16xbf16, #tpu.memory_space<vmem>>, vector<1x1x16xbf16>,
    %39 = vector.extract_strided_slice %11 {offsets = [0, 80], sizes = [1, 16], strides = [1, 1]} : vector<1x256xf32> to vector<1x16xf32>
    %40 = arith.truncf %39 : vector<1x16xf32> to vector<1x16xbf16>
    %c2_21 = arith.constant 2 : index
    %c2_22 = arith.constant 2 : index
    %c0_23 = arith.constant 0 : index
    %41 = vector.load %arg10[%c2_21, %c2_22, %c0_23] : memref<6x6x16xbf16, #tpu.memory_space<vmem>>, vector<1x1x16xbf16>
    %42 = vector.shape_cast %41 : vector<1x1x16xbf16> to vector<1x16xbf16>
    %43 = vector.shape_cast %40 : vector<1x16xbf16> to vector<1x1x16xbf16>
    tpu.vector_store %arg10[%c2_21, %c2_22, %c0_23], %43 {strides = array<i32>} : memref<6x6x16xbf16, #tpu.memory_space<vmem>>, vector<1x1x16xbf16>,
    %44 = vector.extract_strided_slice %11 {offsets = [0, 96], sizes = [1, 16], strides = [1, 1]} : vector<1x256xf32> to vector<1x16xf32>
    %45 = arith.truncf %44 : vector<1x16xf32> to vector<1x16xbf16>
    %c2_24 = arith.constant 2 : index
    %c3_25 = arith.constant 3 : index
    %c0_26 = arith.constant 0 : index
    %46 = vector.load %arg10[%c2_24, %c3_25, %c0_26] : memref<6x6x16xbf16, #tpu.memory_space<vmem>>, vector<1x1x16xbf16>
    %47 = vector.shape_cast %46 : vector<1x1x16xbf16> to vector<1x16xbf16>
    %48 = vector.shape_cast %45 : vector<1x16xbf16> to vector<1x1x16xbf16>
    tpu.vector_store %arg10[%c2_24, %c3_25, %c0_26], %48 {strides = array<i32>} : memref<6x6x16xbf16, #tpu.memory_space<vmem>>, vector<1x1x16xbf16>,
    %49 = vector.extract_strided_slice %11 {offsets = [0, 112], sizes = [1, 16], strides = [1, 1]} : vector<1x256xf32> to vector<1x16xf32>
    %50 = arith.truncf %49 : vector<1x16xf32> to vector<1x16xbf16>
    %c2_27 = arith.constant 2 : index
    %c4_28 = arith.constant 4 : index
    %c0_29 = arith.constant 0 : index
    %51 = vector.load %arg10[%c2_27, %c4_28, %c0_29] : memref<6x6x16xbf16, #tpu.memory_space<vmem>>, vector<1x1x16xbf16>
    %52 = vector.shape_cast %51 : vector<1x1x16xbf16> to vector<1x16xbf16>
    %53 = vector.shape_cast %50 : vector<1x16xbf16> to vector<1x1x16xbf16>
    tpu.vector_store %arg10[%c2_27, %c4_28, %c0_29], %53 {strides = array<i32>} : memref<6x6x16xbf16, #tpu.memory_space<vmem>>, vector<1x1x16xbf16>,
    %54 = vector.extract_strided_slice %11 {offsets = [0, 128], sizes = [1, 16], strides = [1, 1]} : vector<1x256xf32> to vector<1x16xf32>
    %55 = arith.truncf %54 : vector<1x16xf32> to vector<1x16xbf16>
    %c3_30 = arith.constant 3 : index
    %c1_31 = arith.constant 1 : index
    %c0_32 = arith.constant 0 : index
    %56 = vector.load %arg10[%c3_30, %c1_31, %c0_32] : memref<6x6x16xbf16, #tpu.memory_space<vmem>>, vector<1x1x16xbf16>
    %57 = vector.shape_cast %56 : vector<1x1x16xbf16> to vector<1x16xbf16>
    %58 = vector.shape_cast %55 : vector<1x16xbf16> to vector<1x1x16xbf16>
    tpu.vector_store %arg10[%c3_30, %c1_31, %c0_32], %58 {strides = array<i32>} : memref<6x6x16xbf16, #tpu.memory_space<vmem>>, vector<1x1x16xbf16>,
    %59 = vector.extract_strided_slice %11 {offsets = [0, 144], sizes = [1, 16], strides = [1, 1]} : vector<1x256xf32> to vector<1x16xf32>
    %60 = arith.truncf %59 : vector<1x16xf32> to vector<1x16xbf16>
    %c3_33 = arith.constant 3 : index
    %c2_34 = arith.constant 2 : index
    %c0_35 = arith.constant 0 : index
    %61 = vector.load %arg10[%c3_33, %c2_34, %c0_35] : memref<6x6x16xbf16, #tpu.memory_space<vmem>>, vector<1x1x16xbf16>
    %62 = vector.shape_cast %61 : vector<1x1x16xbf16> to vector<1x16xbf16>
    %63 = vector.shape_cast %60 : vector<1x16xbf16> to vector<1x1x16xbf16>
    tpu.vector_store %arg10[%c3_33, %c2_34, %c0_35], %63 {strides = array<i32>} : memref<6x6x16xbf16, #tpu.memory_space<vmem>>, vector<1x1x16xbf16>,
    %64 = vector.extract_strided_slice %11 {offsets = [0, 160], sizes = [1, 16], strides = [1, 1]} : vector<1x256xf32> to vector<1x16xf32>
    %65 = arith.truncf %64 : vector<1x16xf32> to vector<1x16xbf16>
    %c3_36 = arith.constant 3 : index
    %c3_37 = arith.constant 3 : index
    %c0_38 = arith.constant 0 : index
    %66 = vector.load %arg10[%c3_36, %c3_37, %c0_38] : memref<6x6x16xbf16, #tpu.memory_space<vmem>>, vector<1x1x16xbf16>
    %67 = vector.shape_cast %66 : vector<1x1x16xbf16> to vector<1x16xbf16>
    %68 = vector.shape_cast %65 : vector<1x16xbf16> to vector<1x1x16xbf16>
    tpu.vector_store %arg10[%c3_36, %c3_37, %c0_38], %68 {strides = array<i32>} : memref<6x6x16xbf16, #tpu.memory_space<vmem>>, vector<1x1x16xbf16>,
    %69 = vector.extract_strided_slice %11 {offsets = [0, 176], sizes = [1, 16], strides = [1, 1]} : vector<1x256xf32> to vector<1x16xf32>
    %70 = arith.truncf %69 : vector<1x16xf32> to vector<1x16xbf16>
    %c3_39 = arith.constant 3 : index
    %c4_40 = arith.constant 4 : index
    %c0_41 = arith.constant 0 : index
    %71 = vector.load %arg10[%c3_39, %c4_40, %c0_41] : memref<6x6x16xbf16, #tpu.memory_space<vmem>>, vector<1x1x16xbf16>
    %72 = vector.shape_cast %71 : vector<1x1x16xbf16> to vector<1x16xbf16>
    %73 = vector.shape_cast %70 : vector<1x16xbf16> to vector<1x1x16xbf16>
    tpu.vector_store %arg10[%c3_39, %c4_40, %c0_41], %73 {strides = array<i32>} : memref<6x6x16xbf16, #tpu.memory_space<vmem>>, vector<1x1x16xbf16>,
    %74 = vector.extract_strided_slice %11 {offsets = [0, 192], sizes = [1, 16], strides = [1, 1]} : vector<1x256xf32> to vector<1x16xf32>
    %75 = arith.truncf %74 : vector<1x16xf32> to vector<1x16xbf16>
    %c4_42 = arith.constant 4 : index
    %c1_43 = arith.constant 1 : index
    %c0_44 = arith.constant 0 : index
    %76 = vector.load %arg10[%c4_42, %c1_43, %c0_44] : memref<6x6x16xbf16, #tpu.memory_space<vmem>>, vector<1x1x16xbf16>
    %77 = vector.shape_cast %76 : vector<1x1x16xbf16> to vector<1x16xbf16>
    %78 = vector.shape_cast %75 : vector<1x16xbf16> to vector<1x1x16xbf16>
    tpu.vector_store %arg10[%c4_42, %c1_43, %c0_44], %78 {strides = array<i32>} : memref<6x6x16xbf16, #tpu.memory_space<vmem>>, vector<1x1x16xbf16>,
    %79 = vector.extract_strided_slice %11 {offsets = [0, 208], sizes = [1, 16], strides = [1, 1]} : vector<1x256xf32> to vector<1x16xf32>
    %80 = arith.truncf %79 : vector<1x16xf32> to vector<1x16xbf16>
    %c4_45 = arith.constant 4 : index
    %c2_46 = arith.constant 2 : index
    %c0_47 = arith.constant 0 : index
    %81 = vector.load %arg10[%c4_45, %c2_46, %c0_47] : memref<6x6x16xbf16, #tpu.memory_space<vmem>>, vector<1x1x16xbf16>
    %82 = vector.shape_cast %81 : vector<1x1x16xbf16> to vector<1x16xbf16>
    %83 = vector.shape_cast %80 : vector<1x16xbf16> to vector<1x1x16xbf16>
    tpu.vector_store %arg10[%c4_45, %c2_46, %c0_47], %83 {strides = array<i32>} : memref<6x6x16xbf16, #tpu.memory_space<vmem>>, vector<1x1x16xbf16>,
    %84 = vector.extract_strided_slice %11 {offsets = [0, 224], sizes = [1, 16], strides = [1, 1]} : vector<1x256xf32> to vector<1x16xf32>
    %85 = arith.truncf %84 : vector<1x16xf32> to vector<1x16xbf16>
    %c4_48 = arith.constant 4 : index
    %c3_49 = arith.constant 3 : index
    %c0_50 = arith.constant 0 : index
    %86 = vector.load %arg10[%c4_48, %c3_49, %c0_50] : memref<6x6x16xbf16, #tpu.memory_space<vmem>>, vector<1x1x16xbf16>
    %87 = vector.shape_cast %86 : vector<1x1x16xbf16> to vector<1x16xbf16>
    %88 = vector.shape_cast %85 : vector<1x16xbf16> to vector<1x1x16xbf16>
    tpu.vector_store %arg10[%c4_48, %c3_49, %c0_50], %88 {strides = array<i32>} : memref<6x6x16xbf16, #tpu.memory_space<vmem>>, vector<1x1x16xbf16>,
    %89 = vector.extract_strided_slice %11 {offsets = [0, 240], sizes = [1, 16], strides = [1, 1]} : vector<1x256xf32> to vector<1x16xf32>
    %90 = arith.truncf %89 : vector<1x16xf32> to vector<1x16xbf16>
    %c4_51 = arith.constant 4 : index
    %c4_52 = arith.constant 4 : index
    %c0_53 = arith.constant 0 : index
    %91 = vector.load %arg10[%c4_51, %c4_52, %c0_53] : memref<6x6x16xbf16, #tpu.memory_space<vmem>>, vector<1x1x16xbf16>
    %92 = vector.shape_cast %91 : vector<1x1x16xbf16> to vector<1x16xbf16>
    %93 = vector.shape_cast %90 : vector<1x16xbf16> to vector<1x1x16xbf16>
    tpu.vector_store %arg10[%c4_51, %c4_52, %c0_53], %93 {strides = array<i32>} : memref<6x6x16xbf16, #tpu.memory_space<vmem>>, vector<1x1x16xbf16>,
    %cst_54 = arith.constant 0.000000e+00 : f32
    %94 = vector.broadcast %cst_54 : f32 to vector<16x16xf32>
    %c0_55 = arith.constant 0 : index
    %c0_56 = arith.constant 0 : index
    %c0_57 = arith.constant 0 : index
    %95 = vector.load %arg10[%c0_55, %c0_56, %c0_57] : memref<6x6x16xbf16, #tpu.memory_space<vmem>>, vector<6x4x16xbf16>
    %96 = vector.shape_cast %95 : vector<6x4x16xbf16> to vector<24x16xbf16>
    %97 = vector.extract_strided_slice %96 {offsets = [0, 0], sizes = [16, 16], strides = [1, 1]} : vector<24x16xbf16> to vector<16x16xbf16>
    %c0_58 = arith.constant 0 : index
    %c0_59 = arith.constant 0 : index
    %c0_60 = arith.constant 0 : index
    %c0_61 = arith.constant 0 : index
    %98 = vector.load %arg4[%c0_58, %c0_59, %c0_60, %c0_61] : memref<3x3x16x16xbf16, #tpu.memory_space<vmem>>, vector<1x1x16x16xbf16>
    %99 = vector.shape_cast %98 : vector<1x1x16x16xbf16> to vector<16x16xbf16>
    %cst_62 = arith.constant dense<0.000000e+00> : vector<16x16xf32>
    %100 = tpu.matmul %97, %99, %cst_62 {dimension_numbers = #tpu.dot_dimension_numbers<[1], [0], [0], [1], [0, 0, 1, 1], [], []>} : vector<16x16xbf16>, vector<16x16xbf16>, vector<16x16xf32> -> vector<16x16xf32>
    %101 = arith.addf %94, %100 : vector<16x16xf32>
    %102 = vector.extract_strided_slice %96 {offsets = [4, 0], sizes = [16, 16], strides = [1, 1]} : vector<24x16xbf16> to vector<16x16xbf16>
    %c1_63 = arith.constant 1 : index
    %c0_64 = arith.constant 0 : index
    %c0_65 = arith.constant 0 : index
    %c0_66 = arith.constant 0 : index
    %103 = vector.load %arg4[%c1_63, %c0_64, %c0_65, %c0_66] : memref<3x3x16x16xbf16, #tpu.memory_space<vmem>>, vector<1x1x16x16xbf16>
    %104 = vector.shape_cast %103 : vector<1x1x16x16xbf16> to vector<16x16xbf16>
    %cst_67 = arith.constant dense<0.000000e+00> : vector<16x16xf32>
    %105 = tpu.matmul %102, %104, %cst_67 {dimension_numbers = #tpu.dot_dimension_numbers<[1], [0], [0], [1], [0, 0, 1, 1], [], []>} : vector<16x16xbf16>, vector<16x16xbf16>, vector<16x16xf32> -> vector<16x16xf32>
    %106 = arith.addf %101, %105 : vector<16x16xf32>
    %107 = vector.extract_strided_slice %96 {offsets = [8, 0], sizes = [16, 16], strides = [1, 1]} : vector<24x16xbf16> to vector<16x16xbf16>
    %c2_68 = arith.constant 2 : index
    %c0_69 = arith.constant 0 : index
    %c0_70 = arith.constant 0 : index
    %c0_71 = arith.constant 0 : index
    %108 = vector.load %arg4[%c2_68, %c0_69, %c0_70, %c0_71] : memref<3x3x16x16xbf16, #tpu.memory_space<vmem>>, vector<1x1x16x16xbf16>
    %109 = vector.shape_cast %108 : vector<1x1x16x16xbf16> to vector<16x16xbf16>
    %cst_72 = arith.constant dense<0.000000e+00> : vector<16x16xf32>
    %110 = tpu.matmul %107, %109, %cst_72 {dimension_numbers = #tpu.dot_dimension_numbers<[1], [0], [0], [1], [0, 0, 1, 1], [], []>} : vector<16x16xbf16>, vector<16x16xbf16>, vector<16x16xf32> -> vector<16x16xf32>
    %111 = arith.addf %106, %110 : vector<16x16xf32>
    %c0_73 = arith.constant 0 : index
    %c1_74 = arith.constant 1 : index
    %c0_75 = arith.constant 0 : index
    %112 = vector.load %arg10[%c0_73, %c1_74, %c0_75] : memref<6x6x16xbf16, #tpu.memory_space<vmem>>, vector<6x4x16xbf16>
    %113 = vector.shape_cast %112 : vector<6x4x16xbf16> to vector<24x16xbf16>
    %114 = vector.extract_strided_slice %113 {offsets = [0, 0], sizes = [16, 16], strides = [1, 1]} : vector<24x16xbf16> to vector<16x16xbf16>
    %c0_76 = arith.constant 0 : index
    %c1_77 = arith.constant 1 : index
    %c0_78 = arith.constant 0 : index
    %c0_79 = arith.constant 0 : index
    %115 = vector.load %arg4[%c0_76, %c1_77, %c0_78, %c0_79] : memref<3x3x16x16xbf16, #tpu.memory_space<vmem>>, vector<1x1x16x16xbf16>
    %116 = vector.shape_cast %115 : vector<1x1x16x16xbf16> to vector<16x16xbf16>
    %cst_80 = arith.constant dense<0.000000e+00> : vector<16x16xf32>
    %117 = tpu.matmul %114, %116, %cst_80 {dimension_numbers = #tpu.dot_dimension_numbers<[1], [0], [0], [1], [0, 0, 1, 1], [], []>} : vector<16x16xbf16>, vector<16x16xbf16>, vector<16x16xf32> -> vector<16x16xf32>
    %118 = arith.addf %111, %117 : vector<16x16xf32>
    %119 = vector.extract_strided_slice %113 {offsets = [4, 0], sizes = [16, 16], strides = [1, 1]} : vector<24x16xbf16> to vector<16x16xbf16>
    %c1_81 = arith.constant 1 : index
    %c1_82 = arith.constant 1 : index
    %c0_83 = arith.constant 0 : index
    %c0_84 = arith.constant 0 : index
    %120 = vector.load %arg4[%c1_81, %c1_82, %c0_83, %c0_84] : memref<3x3x16x16xbf16, #tpu.memory_space<vmem>>, vector<1x1x16x16xbf16>
    %121 = vector.shape_cast %120 : vector<1x1x16x16xbf16> to vector<16x16xbf16>
    %cst_85 = arith.constant dense<0.000000e+00> : vector<16x16xf32>
    %122 = tpu.matmul %119, %121, %cst_85 {dimension_numbers = #tpu.dot_dimension_numbers<[1], [0], [0], [1], [0, 0, 1, 1], [], []>} : vector<16x16xbf16>, vector<16x16xbf16>, vector<16x16xf32> -> vector<16x16xf32>
    %123 = arith.addf %118, %122 : vector<16x16xf32>
    %124 = vector.extract_strided_slice %113 {offsets = [8, 0], sizes = [16, 16], strides = [1, 1]} : vector<24x16xbf16> to vector<16x16xbf16>
    %c2_86 = arith.constant 2 : index
    %c1_87 = arith.constant 1 : index
    %c0_88 = arith.constant 0 : index
    %c0_89 = arith.constant 0 : index
    %125 = vector.load %arg4[%c2_86, %c1_87, %c0_88, %c0_89] : memref<3x3x16x16xbf16, #tpu.memory_space<vmem>>, vector<1x1x16x16xbf16>
    %126 = vector.shape_cast %125 : vector<1x1x16x16xbf16> to vector<16x16xbf16>
    %cst_90 = arith.constant dense<0.000000e+00> : vector<16x16xf32>
    %127 = tpu.matmul %124, %126, %cst_90 {dimension_numbers = #tpu.dot_dimension_numbers<[1], [0], [0], [1], [0, 0, 1, 1], [], []>} : vector<16x16xbf16>, vector<16x16xbf16>, vector<16x16xf32> -> vector<16x16xf32>
    %128 = arith.addf %123, %127 : vector<16x16xf32>
    %c0_91 = arith.constant 0 : index
    %c2_92 = arith.constant 2 : index
    %c0_93 = arith.constant 0 : index
    %129 = vector.load %arg10[%c0_91, %c2_92, %c0_93] : memref<6x6x16xbf16, #tpu.memory_space<vmem>>, vector<6x4x16xbf16>
    %130 = vector.shape_cast %129 : vector<6x4x16xbf16> to vector<24x16xbf16>
    %131 = vector.extract_strided_slice %130 {offsets = [0, 0], sizes = [16, 16], strides = [1, 1]} : vector<24x16xbf16> to vector<16x16xbf16>
    %c0_94 = arith.constant 0 : index
    %c2_95 = arith.constant 2 : index
    %c0_96 = arith.constant 0 : index
    %c0_97 = arith.constant 0 : index
    %132 = vector.load %arg4[%c0_94, %c2_95, %c0_96, %c0_97] : memref<3x3x16x16xbf16, #tpu.memory_space<vmem>>, vector<1x1x16x16xbf16>
    %133 = vector.shape_cast %132 : vector<1x1x16x16xbf16> to vector<16x16xbf16>
    %cst_98 = arith.constant dense<0.000000e+00> : vector<16x16xf32>
    %134 = tpu.matmul %131, %133, %cst_98 {dimension_numbers = #tpu.dot_dimension_numbers<[1], [0], [0], [1], [0, 0, 1, 1], [], []>} : vector<16x16xbf16>, vector<16x16xbf16>, vector<16x16xf32> -> vector<16x16xf32>
    %135 = arith.addf %128, %134 : vector<16x16xf32>
    %136 = vector.extract_strided_slice %130 {offsets = [4, 0], sizes = [16, 16], strides = [1, 1]} : vector<24x16xbf16> to vector<16x16xbf16>
    %c1_99 = arith.constant 1 : index
    %c2_100 = arith.constant 2 : index
    %c0_101 = arith.constant 0 : index
    %c0_102 = arith.constant 0 : index
    %137 = vector.load %arg4[%c1_99, %c2_100, %c0_101, %c0_102] : memref<3x3x16x16xbf16, #tpu.memory_space<vmem>>, vector<1x1x16x16xbf16>
    %138 = vector.shape_cast %137 : vector<1x1x16x16xbf16> to vector<16x16xbf16>
    %cst_103 = arith.constant dense<0.000000e+00> : vector<16x16xf32>
    %139 = tpu.matmul %136, %138, %cst_103 {dimension_numbers = #tpu.dot_dimension_numbers<[1], [0], [0], [1], [0, 0, 1, 1], [], []>} : vector<16x16xbf16>, vector<16x16xbf16>, vector<16x16xf32> -> vector<16x16xf32>
    %140 = arith.addf %135, %139 : vector<16x16xf32>
    %141 = vector.extract_strided_slice %130 {offsets = [8, 0], sizes = [16, 16], strides = [1, 1]} : vector<24x16xbf16> to vector<16x16xbf16>
    %c2_104 = arith.constant 2 : index
    %c2_105 = arith.constant 2 : index
    %c0_106 = arith.constant 0 : index
    %c0_107 = arith.constant 0 : index
    %142 = vector.load %arg4[%c2_104, %c2_105, %c0_106, %c0_107] : memref<3x3x16x16xbf16, #tpu.memory_space<vmem>>, vector<1x1x16x16xbf16>
    %143 = vector.shape_cast %142 : vector<1x1x16x16xbf16> to vector<16x16xbf16>
    %cst_108 = arith.constant dense<0.000000e+00> : vector<16x16xf32>
    %144 = tpu.matmul %141, %143, %cst_108 {dimension_numbers = #tpu.dot_dimension_numbers<[1], [0], [0], [1], [0, 0, 1, 1], [], []>} : vector<16x16xbf16>, vector<16x16xbf16>, vector<16x16xf32> -> vector<16x16xf32>
    %145 = arith.addf %140, %144 : vector<16x16xf32>
    %c0_109 = arith.constant 0 : index
    %c0_110 = arith.constant 0 : index
    %146 = vector.load %arg5[%c0_109, %c0_110] : memref<1x16xf32, #tpu.memory_space<vmem>>, vector<1x16xf32>
    %147 = vector.broadcast %146 : vector<1x16xf32> to vector<16x16xf32>
    %148 = arith.addf %145, %147 : vector<16x16xf32>
    %cst_111 = arith.constant 0.000000e+00 : f32
    %149 = vector.broadcast %cst_111 : f32 to vector<16x16xf32>
    %150 = arith.cmpf oge, %148, %149 : vector<16x16xf32>
    %cst_112 = arith.constant 2.000000e-01 : f32
    %151 = vector.broadcast %cst_112 : f32 to vector<16x16xf32>
    %152 = arith.mulf %151, %148 : vector<16x16xf32>
    %153 = arith.select %150, %148, %152 : vector<16x16xi1>, vector<16x16xf32>
    %154 = arith.mulf %153, %153 : vector<16x16xf32>
    %cst_113 = arith.constant dense<0.000000e+00> : vector<16xf32>
    %155 = vector.multi_reduction <add>, %154, %cst_113 [1] : vector<16x16xf32> to vector<16xf32>
    %156 = vector.shape_cast %155 : vector<16xf32> to vector<16x1xf32>
    %cst_114 = arith.constant 1.600000e+01 : f32
    %157 = vector.broadcast %cst_114 : f32 to vector<16x1xf32>
    %158 = arith.divf %156, %157 : vector<16x1xf32>
    %cst_115 = arith.constant 9.99999993E-9 : f32
    %159 = vector.broadcast %cst_115 : f32 to vector<16x1xf32>
    %160 = arith.addf %158, %159 : vector<16x1xf32>
    %161 = math.rsqrt %160 : vector<16x1xf32>
    %162 = vector.broadcast %161 : vector<16x1xf32> to vector<16x16xf32>
    %163 = arith.mulf %153, %162 : vector<16x16xf32>
    %164 = vector.shape_cast %163 : vector<16x16xf32> to vector<1x4x4x16xf32>
    %165 = arith.truncf %164 : vector<1x4x4x16xf32> to vector<1x4x4x16xbf16>
    %c0_116 = arith.constant 0 : index
    %c0_117 = arith.constant 0 : index
    %c0_118 = arith.constant 0 : index
    %c0_119 = arith.constant 0 : index
    %166 = vector.load %arg8[%c0_116, %c0_117, %c0_118, %c0_119] : memref<1x4x4x16xbf16, #tpu.memory_space<vmem>>, vector<1x4x4x16xbf16>
    tpu.vector_store %arg8[%c0_116, %c0_117, %c0_118, %c0_119], %165 {strides = array<i32>} : memref<1x4x4x16xbf16, #tpu.memory_space<vmem>>, vector<1x4x4x16xbf16>,
    %c0_120 = arith.constant 0 : index
    %c0_121 = arith.constant 0 : index
    %167 = vector.load %arg6[%c0_120, %c0_121] : memref<3x16xbf16, #tpu.memory_space<vmem>>, vector<3x16xbf16>
    %168 = arith.truncf %163 : vector<16x16xf32> to vector<16x16xbf16>
    %cst_122 = arith.constant dense<0.000000e+00> : vector<3x16xf32>
    %169 = tpu.matmul %167, %168, %cst_122 {dimension_numbers = #tpu.dot_dimension_numbers<[1], [1], [0], [0], [0, 0, 1, 0], [], []>} : vector<3x16xbf16>, vector<16x16xbf16>, vector<3x16xf32> -> vector<3x16xf32>
    %c0_123 = arith.constant 0 : index
    %c0_124 = arith.constant 0 : index
    %170 = vector.load %arg7[%c0_123, %c0_124] : memref<3x1xf32, #tpu.memory_space<vmem>>, vector<3x1xf32>
    %171 = vector.broadcast %170 : vector<3x1xf32> to vector<3x16xf32>
    %172 = arith.addf %169, %171 : vector<3x16xf32>
    %173 = vector.shape_cast %172 : vector<3x16xf32> to vector<1x3x16xf32>
    %174 = arith.truncf %173 : vector<1x3x16xf32> to vector<1x3x16xbf16>
    %c0_125 = arith.constant 0 : index
    %c0_126 = arith.constant 0 : index
    %c0_127 = arith.constant 0 : index
    %175 = vector.load %arg9[%c0_125, %c0_126, %c0_127] : memref<1x3x16xbf16, #tpu.memory_space<vmem>>, vector<1x3x16xbf16>
    tpu.vector_store %arg9[%c0_125, %c0_126, %c0_127], %174 {strides = array<i32>} : memref<1x3x16xbf16, #tpu.memory_space<vmem>>, vector<1x3x16xbf16>,
    return
  }
  func.func @transform_0(%arg0: i32) -> (i32, i32) {
    %c0_i32 = arith.constant 0 : i32
    %c0_i32_0 = arith.constant 0 : i32
    %c0_i32_1 = arith.constant 0 : i32
    return %c0_i32, %c0_i32_0 : i32, i32
  }
  func.func @transform_1(%arg0: i32) -> (i32, i32) {
    %c0_i32 = arith.constant 0 : i32
    %c0_i32_0 = arith.constant 0 : i32
    %c0_i32_1 = arith.constant 0 : i32
    return %c0_i32, %c0_i32_0 : i32, i32
  }
  func.func @transform_2(%arg0: i32) -> (i32, i32) {
    %c0_i32 = arith.constant 0 : i32
    %c0_i32_0 = arith.constant 0 : i32
    %c0_i32_1 = arith.constant 0 : i32
    return %c0_i32, %c0_i32_0 : i32, i32
  }
  func.func @transform_3(%arg0: i32) -> (i32, i32, i32, i32) {
    %c0_i32 = arith.constant 0 : i32
    %c0_i32_0 = arith.constant 0 : i32
    %c0_i32_1 = arith.constant 0 : i32
    %c0_i32_2 = arith.constant 0 : i32
    %c0_i32_3 = arith.constant 0 : i32
    return %c0_i32, %c0_i32_0, %c0_i32_1, %c0_i32_2 : i32, i32, i32, i32
  }
  func.func @transform_4(%arg0: i32) -> (i32, i32) {
    %c0_i32 = arith.constant 0 : i32
    %c0_i32_0 = arith.constant 0 : i32
    %c0_i32_1 = arith.constant 0 : i32
    return %c0_i32, %c0_i32_0 : i32, i32
  }
  func.func @transform_5(%arg0: i32) -> (i32, i32) {
    %c0_i32 = arith.constant 0 : i32
    %c0_i32_0 = arith.constant 0 : i32
    %c0_i32_1 = arith.constant 0 : i32
    return %c0_i32, %c0_i32_0 : i32, i32
  }
  func.func @transform_6(%arg0: i32) -> (i32, i32) {
    %c0_i32 = arith.constant 0 : i32
    %c0_i32_0 = arith.constant 0 : i32
    %c0_i32_1 = arith.constant 0 : i32
    return %c0_i32, %c0_i32_0 : i32, i32
  }
  func.func @transform_7(%arg0: i32) -> (i32, i32, i32, i32) {
    %c0_i32 = arith.constant 0 : i32
    %c0_i32_0 = arith.constant 0 : i32
    %c0_i32_1 = arith.constant 0 : i32
    %c0_i32_2 = arith.constant 0 : i32
    return %arg0, %c0_i32, %c0_i32_0, %c0_i32_1 : i32, i32, i32, i32
  }
  func.func @transform_8(%arg0: i32) -> (i32, i32, i32) {
    %c0_i32 = arith.constant 0 : i32
    %c0_i32_0 = arith.constant 0 : i32
    %c0_i32_1 = arith.constant 0 : i32
    return %arg0, %c0_i32, %c0_i32_0 : i32, i32, i32
  }
}

</mosaic_0001>

<bundles_post_ra>
// kernel: tpu_custom_call.1
= control target key start
LH: loop header
LB: loop body
LE: loop exit
PB: predicated region body
PF: predicated region fallthrough
CT: control target
= control target key end

     0   :  { %14 = vsyncpa [#allocation4], 0  ;;  %s2452_s0 = inlined_call_operand.vmem [shape: f32[2,16], index: 0, kind: input, shape index: {}]   ;;  %s2453_s1 = inlined_call_operand.hbm [shape: bf16[16,256], index: 1, kind: input, shape index: {}]   ;;  %s2454_s2 = inlined_call_operand.vmem [shape: f32[1,256], index: 2, kind: input, shape index: {}]   ;;  %s2455_s3 = inlined_call_operand.hbm [shape: bf16[3,3,16,16], index: 3, kind: input, shape index: {}]   ;;  %s2456_s4 = inlined_call_operand.vmem [shape: f32[1,16], index: 4, kind: input, shape index: {}]   ;;  %s2457_s5 = inlined_call_operand.vmem [shape: bf16[3,16], index: 5, kind: input, shape index: {}]   ;;  %s2458_s6 = inlined_call_operand.vmem [shape: f32[3,1], index: 6, kind: input, shape index: {}]   ;;  %s2459_s7 = inlined_call_operand.hbm [shape: bf16[2,4,4,16], index: 7, kind: output, shape index: {0}]   ;;  %s2460_s8 = inlined_call_operand.vmem [shape: bf16[2,3,16], index: 8, kind: output, shape index: {1}]  }
   0x1   :  { %15 = vsyncpa [#allocation7], 0 }
   0x2   :  { %16 = vsyncpa [#allocation5], 0 }
   0x3   :  { %18 = vsyncpa [#allocation5 + $0x1], 0  ;;  %s2074_s27 = smov 0   ;;  %s2076_s28 = smov 0  }
   0x4   :  { %s2078_s29 = smov 0   ;;  %s2080_s30 = smov 0  }
   0x5 LB: > { %s2095_s9 = sadd.s32 4294967295, %s2008_s30   ;;  %s1635_s10 = sadd.s32 4294967294, %s2008_s30   ;;  %s2008_s30 = sphi %s2080_s30, %s2490_s30   ;;  %s2004_s29 = sphi %s2078_s29, %s2489_s29   ;;  %s2000_s28 = sphi %s2076_s28, %s2488_s28   ;;  %s1996_s27 = sphi %s2074_s27, %s2487_s27  }
   0x6   : > { %s2099_s11 = sadd.s32 1, %s2008_s30   ;;  %s178_s12 = sadd.s32 1, %s2004_s29 }
   0x7   : > { %s175_s13 = ssub.s32 %s2008_s30, %s2099_s11  ;;  %p188_p0 = scmp.ne.s32.totalorder %s2004_s29, %s2000_s28 }
   0x8   : > { %p176_p1 = scmp.eq.s32.totalorder %s175_s13, 0  ;;  %p189_p2 = scmp.eq.s32.totalorder %s2095_s9, 1 }
   0x9   : > { %p194_p3 = scmp.ne.s32.totalorder %s2000_s28, %s1996_s27  ;;  %p195_p4 = scmp.eq.s32.totalorder %s1635_s10, 1 }
   0xa   : > { %s2110_s14 = scalar_select %p176_p1, %s2004_s29, %s178_s12  }
   0xb   : > { %p2112_p5 = por %p189_p2, %p188_p0  ;;  %p2116_p6 = por %p195_p4, %p194_p3 }
   0xc   : > { %p1636_p7 = scmp.ge.s32.totalorder %s2008_s30, 1  ;;  %p228_p8 = scmp.lt.s32.totalorder %s2008_s30, 3 }
   0xd   : > { %s2463_s16 = scalar_select %p2116_p6, 1, 0 }
   0xe   : > { %p2461_p9 = scmp.eq.s32.totalorder %s2095_s9, 0  ;;  %p2123_p10 = pnand %p1636_p7, %p228_p8 }
   0xf   : > { %s2010_s18 = smov [#allocation3]   ;;  %s2011_s21 = smov [#allocation6]  }
  0x10   : > { %s243_s19 = sshll.u32 %s2010_s18, 4  ;;  %p1785_p11 = pneg %p2123_p10  ;;  %s244_s19 = int_to_ptr.vmem [resolvable:$true] %s243_s19 }
  0x11   : > { %s259_s22 = sshll.u32 %s2011_s21, 4  ;;  %s1899_s23 = scalar_lea.vmem %s244_s19, 256  ;;  %s260_s22 = int_to_ptr.vmem [resolvable:$true] %s259_s22 }
  0x12   : > { %p2131_p12 = pnand %p2461_p9, %p1785_p11  ;;  %p1900_p0 = scmp.ne.s32.totalorder %s244_s19, %s1899_s23 }
  0x13   : > { %p1907_p3 = scmp.lt.s32.totalorder %s244_s19, %s244_s19  ;;  %p1908_p4 = scmp.lt.s32.totalorder %s1899_s23, %s1899_s23 }
  0x14   : > { %p1890_p13 = pneg %p2131_p12 }
  0x15   : > { %p1909_p7 = por %p1908_p4, %p1907_p3 }
  0x16   : > { %p1902_p1 = pnand %p1900_p0, %p1890_p13 }
  0x18   : > { %p1903_p2 = pneg %p1902_p1 }
  0x1a   : > { %p1910_p8 = pnand %p1909_p7, %p1903_p2 }
  0x1c   : > { %1913 = shalt.err (!%p1910_p8)
}
  0x1d   : > { %s2012_s24 = smov 128   ;;  %s2013_s25 = smov 8  }
  0x1e   : > { %1788 = dma.hbm_to_vmem [thread:$0]  (!%p2131_p12), %s2453_s1, 256, %s244_s19, [#allocation4], %s2012_s24, %s2012_s24, %s2013_s25  }
  0x1f   : > { %s1925_s12 = scalar_lea.vmem %s260_s22, 1152  ;;  %p1933_p9 = scmp.lt.s32.totalorder %s260_s22, %s260_s22 }
  0x20   : > { %p1926_p11 = scmp.ne.s32.totalorder %s260_s22, %s1925_s12  ;;  %p1934_p6 = scmp.lt.s32.totalorder %s1925_s12, %s1925_s12 }
  0x22   : > { %p1928_p0 = pnand %p1926_p11, %p1890_p13  ;;  %p1935_p3 = por %p1934_p6, %p1933_p9 }
  0x24   : > { %p1929_p1 = pneg %p1928_p0 }
  0x26   : > { %p1936_p2 = pnand %p1935_p3, %p1929_p1 }
  0x28   : > { %1939 = shalt.err (!%p1936_p2)
}
  0x29   : > { %s2014_s13 = smov 64   ;;  %s2015_s18 = smov 4  }
  0x2a   : > { %1791 = dma.hbm_to_vmem [thread:$0]  (!%p2131_p12), %s2455_s3, 1152, %s260_s22, [#allocation7], %s2014_s13, %s2014_s13, %s2015_s18  }
  0x2b   : > { %284 = sbr.rel (%p2123_p10) target bundleno = 1011 (0x3f3), region = 48  ;;  %p2466_p4 = scmp.eq.s32.totalorder (!%p2123_p10), %s2095_s9, 0 }
  0x30   : > { %1983 = dma.done.wait (%p2466_p4), [#allocation4], 256   ;;  %p2467_p13 = pmov %p2466_p4 }
  0x31   : > { %p2468_p6 = pmov %p2466_p4 }
  0x32   : > { %1985 = vsyncadd (%p2467_p13), [#allocation4], 4294967040 }
  0x33   : > { %1987 = dma.done.wait (%p2468_p6), [#allocation7], 1152   ;;  %p2469_p9 = pmov %p2466_p4 }
  0x34   : > { %v2016_v0 = vmov 0   ;;  %s326_s17 = scalar_lea.vmem %s2452_s0, %s2095_s9  ;;  %v1867_v1 = vld [vmem:[#allocation3 + $0x4] ss:$8 sps:$4 sm:$0xff]   ;;  %v1869_v2 = vld [vmem:[#allocation3] ss:$8 sps:$4 sm:$0xff]   ;;  %vm353_vm0 = vcmask 130048   ;;  %v343_v5 = vlaneseq }
  0x35   : > { %1989 = vsyncadd (%p2469_p9), [#allocation7], 4294966144  ;;  %389 = vmatprep.mubr.bf16.mxu0 %v2016_v0  ;;  %1866 = vset.pattern.permute.xlu0 %v2016_v0  ;;  %v327_v3 = vld [vmem:[%s326_s17] sm:$0x1]  ;;  %vm404_vm1 = vcmask 124928   ;;  %vm420_vm3 = vcmask 122880  }
  0x36   : > { %371 = vmatprep.subr.bf16.mxu0 %v1867_v1  ;;  %v328_v4 = vpack.c.bf16 %v327_v3, %v327_v3  ;;  %405 = vst.msk [vmem:[#allocation2] sm:$0x7] %vm404_vm1, %v2016_v0  ;;  %406 = vst.msk [vmem:[#allocation2 + $0x4] sm:$0x7] %vm404_vm1, %v2016_v0  ;;  %v2168_v6 = vshrl.u32 %v343_v5, 7  ;;  %s2017_s25 = smov 112  }
  0x37   : > { %372 = vmatpush1.bf16.msra.mxu0 %v1869_v2  ;;  %410 = vst.msk [vmem:[#allocation2 + $0x14] sm:$0x7] %vm404_vm1, %v2016_v0  ;;  %407 = vst.msk [vmem:[#allocation2 + $0x8] sm:$0x7] %vm404_vm1, %v2016_v0  ;;  %v331_v8 = vld [vmem:[%s2454_s2] sm:$0x3] }
  0x38   : > { %408 = vst.msk [vmem:[#allocation2 + $0xc] sm:$0x7] %vm404_vm1, %v2016_v0  ;;  %409 = vst.msk [vmem:[#allocation2 + $0x10] sm:$0x7] %vm404_vm1, %v2016_v0  ;;  %v345_v7 = vsub.s32 0, %v2168_v6  ;;  %v349_v9 = vsub.s32 1, %v2168_v6 }
  0x39   : > { %vm421_vm5 = vsmask.f32 7938  ;;  %s2018_s26 = smov 48   ;;  %s2019_s10 = smov 96   ;;  %v1870_v37 = vld [vmem:[#allocation6] sm:$0xff]   ;;  %v1871_v38 = vld [vmem:[#allocation6 + $0x18] sm:$0xff]  }
  0x3a   : > { %1646 = vmatmul.mubr.msk.bf16.vlgmr.msra.gmra.mxu0 %vm353_vm0, %v328_v4  ;;  %v346_v10 = vrot.slane %v331_v8, %v345_v7  ;;  %v350_v11 = vrot.slane %v331_v8, %v349_v9  ;;  %vm2175_vm6 = vmand %vm420_vm3, %vm421_vm5  ;;  %v2020_v39 = vmov 0.0   ;;  %s2021_s12 = smov 64   ;;  %vm2022_vm7 = vmmov 0   ;;  %s2023_s13 = smov 32  }
  0x3b   : > { %1721 = vmatprep.subr.bf16.mxu0 %v2020_v39  ;;  %1715 = vmatprep.subr.bf16.mxu1 %v2020_v39  ;;  %s2024_s18 = smov 80   ;;  %s2025_s21 = smov 16   ;;  %vm430_vm8 = vcmask 123905   ;;  %vm431_vm9 = vsmask.f32 1280  ;;  %vm449_vm14 = vcmask 124930  }
  0x3c   : > { %1722 = vmatpush3.bf16.msra.mxu0 %v1870_v37  ;;  %1716 = vmatpush3.bf16.msra.mxu1 %v1871_v38  ;;  %vm2194_vm10 = vmand %vm430_vm8, %vm431_vm9  ;;  %vm440_vm11 = vsmask.f32 7942  ;;  %vm813_vm13 = vsmask.f32 3336  ;;  %vm450_vm15 = vsmask.f32 2304 }
  0x3d   : > { %v423_v27 = vld [vmem:[#allocation2 + $0x4] sm:$0x1]  ;;  %1723 = vmatprep.mubr.msk.bf16.mxu0 %vm2022_vm7, %v2020_v39  ;;  %1717 = vmatprep.mubr.msk.bf16.mxu1 %vm2022_vm7, %v2020_v39  ;;  %v433_v43 = vld [vmem:[#allocation2 + $0x4] sm:$0x2]  ;;  %vm2207_vm12 = vmand %vm430_vm8, %vm440_vm11  ;;  %vm815_vm3 = vsmask.f32 5392 }
  0x3e   : > { %1727 = vmatprep.subr.bf16.mxu1 %v2020_v39  ;;  %1733 = vmatprep.subr.bf16.mxu0 %v2020_v39  ;;  %v465_v48 = vld [vmem:[#allocation2 + $0x8] sm:$0x2]  ;;  %v1655_v50 = vld.sshfl [vmem:[#allocation2] sm:$0x13 pattern:$0x76325410]  ;;  %vm2217_vm1 = vmand %vm449_vm14, %vm450_vm15 }
  0x3f   : > { %v489_v28 = vld [vmem:[#allocation2 + $0xc] sm:$0x1]  ;;  %v496_v45 = vld [vmem:[#allocation2 + $0xc] sm:$0x2]  ;;  %v523_v52 = vld [vmem:[#allocation2 + $0x10] sm:$0x2]  ;;  %v772_v2 = vcombine.high %v1655_v50, %v1655_v50 }
  0x40   : > { %v820_v55 = vshrl.u32 %v1655_v50, 16  ;;  %v823_v57 = vshll.u32 %v1655_v50, 16  ;;  %v459_v63 = vld [vmem:[#allocation2 + $0x8] sm:$0x1]  ;;  %v517_v0 = vld [vmem:[#allocation2 + $0x10] sm:$0x1] }
  0x41   : > { %vm817_vm5 = vsmask.f32 7448  ;;  %v538_v37 = vld [vmem:[#allocation2] sm:$0x3]  ;;  %vm1171_vm8 = vcmask 1040384   ;;  %vm1174_vm11 = vcmask 1044484  }
  0x42   : > { %v822_v3 = vrot.slane %v820_v55, 6  ;;  %v825_v9 = vrot.slane %v823_v57, 7  ;;  %s312_s22 = sand.u32 1, %s2000_s28  }
  0x43   : > { %s1642_s24 = sshll.u32 %s312_s22, 3  ;;  %s2403_s20 = scalar_lea.sflag [#allocation5], %s312_s22 }
  0xfa   : > { %v391_v12 = vpop.f32.mrf.mxu0 }
  0xfb   : > { %v392_v13 = vadd.f32 %v391_v12, %v346_v10  ;;  %v2026_v10 = vmov 1983009808  }
  0xfc   : > { %v393_v14 = vpop.f32.mrf.mxu0 }
  0xfd   : > { %vm398_vm2 = vcmp.ge.f32.partialorder %v392_v13, 0.0  ;;  %v400_v15 = vmul.f32 0.2, %v392_v13  ;;  %v394_v16 = vadd.f32 %v393_v14, %v350_v11  ;;  %v556_v11 = vunpack.c.l.s4 %v2026_v10 }
  0xfe   : > { %v395_v17 = vpop.f32.mrf.mxu0 }
  0xff   : > { %v402_v18 = vsel %vm398_vm2, %v392_v13, %v400_v15  ;;  %vm399_vm4 = vcmp.ge.f32.partialorder %v394_v16, 0.0  ;;  %v401_v19 = vmul.f32 0.2, %v394_v16  ;;  %v452_v15 = vld [vmem:[#allocation2 + $0x4] sm:$0x4]  ;;  %vm2227_vm2 = vmor %vm431_vm9, %vm813_vm13 }
 0x100   : > { %v1692_v20 = vpack.c.bf16 %v402_v18, %v402_v18  ;;  %v396_v21 = vpop.f32.mrf.mxu0 }
 0x101   : > { %v403_v22 = vsel %vm399_vm4, %v394_v16, %v401_v19  ;;  %vm816_vm4 = vmor %vm2227_vm2, %vm815_vm3  ;;  %vm1452_vm2 = vcmask 123904  }
 0x102   : > { %v416_v23 = vshll.u32 %v1692_v20, 16  ;;  %v1693_v24 = vpack.c.bf16 %v403_v22, %v403_v22  ;;  %v426_v25 = vrot.slane %v1692_v20, 7  ;;  %v445_v40 = vrot.slane %v1692_v20, 6 }
 0x104   : > { %v485_v29 = vshll.u32 %v1693_v24, 16  ;;  %427 = vrot.lane.b32.xlu0 %v426_v25, %s2017_s25  ;;  %v492_v30 = vrot.slane %v1693_v24, 7  ;;  %v424_v31 = vsel %vm2175_vm6, %v416_v23, %v423_v27  ;;  %v436_v34 = vrot.slane %v416_v23, 7 }
 0x105   : > { %425 = vst [vmem:[#allocation2 + $0x4] sm:$0x1] %v424_v31  ;;  %v506_v41 = vrot.slane %v1693_v24, 6  ;;  %v829_v24 = vshll.u32 %v772_v2, 16 }
 0x106   : > { %493 = vrot.lane.b32.xlu1 %v492_v30, %s2017_s25  ;;  %v499_v32 = vrot.slane %v485_v29, 7  ;;  %v490_v33 = vsel %vm2175_vm6, %v485_v29, %v489_v28  ;;  %v1851_v36 = vpack.i.bf16 %v485_v29, %v416_v23  ;;  %v477_v23 = vld [vmem:[#allocation2 + $0x8] sm:$0x4]  ;;  %v826_v28 = vor.u32 %v825_v9, %v822_v3  ;;  %s314_s25 = scalar_lea.vmem [#allocation8], %s1642_s24  ;;  %s2027_s24 = smov [#allocation8]  }
 0x107   : > { %491 = vst [vmem:[#allocation2 + $0xc] sm:$0x1] %v490_v33  ;;  %v2235_v29 = vld.sshfl [vmem:[#allocation2 + $0x14] sm:$0x13 pattern:$0x76325410]  ;;  %v557_v33 = vunpack.c.0.s8 %v556_v11 }
 0x108   : > { %462 = vrot.lane.b32.xlu0 %v426_v25, %s2018_s26  ;;  %v1856_v35 = vpack.i.bf16 %v499_v32, %v436_v34  ;;  %v510_v32 = vld [vmem:[#allocation2 + $0xc] sm:$0x4]  ;;  %v890_v38 = vshrl.u32 %v2235_v29, 16  ;;  %v1878_v11 = vld [vmem:[#allocation6 + $0x8] sm:$0xff]   ;;  %s1535_s19 = sshll.u32 %s314_s25, 4  ;;  %s2401_s19 = int_to_ptr.vmem [resolvable:$true] %s1535_s19 }
 0x109   : > { %s1940_s17 = scalar_lea.vmem %s2401_s19, 128 }
 0x10a   : > { %520 = vrot.lane.b32.xlu1 %v492_v30, %s2018_s26  ;;  %p1941_p10 = scmp.ne.s32.totalorder %s2401_s19, %s1940_s17  ;;  %s1944_s26 = sshll.u32 %s2027_s24, 4  ;;  %s1945_s26 = int_to_ptr.vmem [resolvable:$false] %s1944_s26 }
 0x10b   : > { %p1947_p8 = scmp.lt.s32.totalorder %s2401_s19, %s1945_s26 }
 0x10c   : > { %1857 = vrot.lane.b32.xlu0 %v1856_v35, %s2019_s10  ;;  %p1942_p12 = pnand %p1941_p10, %p2112_p5  ;;  %s1946_s10 = scalar_lea.vmem %s1945_s26, 256 }
 0x10d   : > { %p1948_p11 = scmp.lt.s32.totalorder %s1946_s10, %s1940_s17 }
 0x10e   : > { %1852 = vrot.lane.b32.xlu1 %v1851_v36, %s2021_s12  ;;  %v535_v36 = vld [vmem:[#allocation2 + $0x10] sm:$0x4]  ;;  %s1694_s12 = sshll.u32 %s2095_s9, 7  ;;  %p1943_p7 = pneg %p1942_p12 }
 0x10f   : > { %s2399_s23 = scalar_lea.hbm %s2459_s7, %s1694_s12  ;;  %p1949_p0 = por %p1948_p11, %p1947_p8 }
 0x110   : > { %1862 = vrot.lane.b32.xlu0 %v1856_v35, %s2023_s13 }
 0x111   : > { %p1950_p1 = pnand %p1949_p0, %p1943_p7 }
 0x112   : > { %446 = vrot.lane.b32.xlu1 %v445_v40, %s2024_s18 }
 0x114   : > { %474 = vrot.lane.b32.xlu0 %v445_v40, %s2025_s21  ;;  %v893_v40 = vshll.u32 %v2235_v29, 16 }
 0x116   : > { %507 = vrot.lane.b32.xlu1 %v506_v41, %s2024_s18 }
 0x118   : > { %532 = vrot.lane.b32.xlu0 %v506_v41, %s2025_s21 }
 0x176   : > { %v428_v44 = vpop.permute.xlu0 %427 }
 0x177   : > { %v434_v46 = vsel %vm2194_vm10, %v428_v44, %v433_v43  ;;  %v827_v43 = vrot.slane %v826_v28, 2  ;;  %v831_v44 = vrot.slane %v829_v24, 7 }
 0x178   : > { %435 = vst [vmem:[#allocation2 + $0x4] sm:$0x2] %v434_v46  ;;  %v494_v47 = vpop.permute.xlu1 %493 }
 0x179   : > { %v497_v49 = vsel %vm2194_vm10, %v494_v47, %v496_v45  ;;  %v2252_v47 = vld.sshfl [vmem:[#allocation2] sm:$0x12 pattern:$0x76325410] }
 0x17a   : > { %498 = vst [vmem:[#allocation2 + $0xc] sm:$0x2] %v497_v49  ;;  %v463_v51 = vpop.permute.xlu0 %462 }
 0x17b   : > { %v466_v53 = vsel %vm2194_vm10, %v463_v51, %v465_v48  ;;  %v2255_v48 = vsub.s32 %v557_v33, %v2168_v6  ;;  %v1130_v6 = vcombine.high %v2252_v47, %v2252_v47 }
 0x17c   : > { %467 = vst [vmem:[#allocation2 + $0x8] sm:$0x2] %v466_v53  ;;  %v521_v54 = vpop.permute.xlu1 %520  ;;  %v2261_v53 = vrot.slane %v893_v40, 7 }
 0x17d   : > { %v524_v56 = vsel %vm2194_vm10, %v521_v54, %v523_v52  ;;  %v2259_v52 = vrot.slane %v890_v38, 6  ;;  %vm1172_vm10 = vcmask 1042434  }
 0x17e   : > { %525 = vst [vmem:[#allocation2 + $0x10] sm:$0x2] %v524_v56  ;;  %v1858_v59 = vpop.permute.xlu0 %1857  ;;  %vm1173_vm13 = vmor %vm1171_vm8, %vm1172_vm10 }
 0x17f   : > { %v442_v60 = vld [vmem:[#allocation2 + $0x4] sm:$0x2]  ;;  %v1860_v61 = vunpack.i.h.bf16 %v1858_v59  ;;  %v1859_v62 = vunpack.i.l.bf16 %v1858_v59  ;;  %v543_v59 = vld [vmem:[#allocation2 + $0x14] sm:$0x3]  ;;  %v896_v14 = vor.u32 %v2261_v53, %v2259_v52  ;;  %vm2316_vm14 = vmor %vm1173_vm13, %vm1174_vm11 }
 0x180   : > { %v1853_v1 = vpop.permute.xlu1 %1852 }
 0x181   : > { %v503_v4 = vld [vmem:[#allocation2 + $0xc] sm:$0x2]  ;;  %v443_v5 = vsel %vm2207_vm12, %v1859_v62, %v442_v60  ;;  %v1855_v7 = vunpack.i.h.bf16 %v1853_v1  ;;  %v1854_v8 = vunpack.i.l.bf16 %v1853_v1  ;;  %v812_v62 = vcombine.high %v2235_v29, %v2235_v29 }
 0x182   : > { %v504_v12 = vsel %vm2207_vm12, %v1860_v61, %v503_v4  ;;  %444 = vst [vmem:[#allocation2 + $0x4] sm:$0x2] %v443_v5  ;;  %v1863_v13 = vpop.permute.xlu0 %1862 }
 0x183   : > { %505 = vst [vmem:[#allocation2 + $0xc] sm:$0x2] %v504_v12  ;;  %v518_v16 = vsel %vm2175_vm6, %v1855_v7, %v517_v0  ;;  %v460_v17 = vsel %vm2175_vm6, %v1854_v8, %v459_v63  ;;  %v471_v18 = vld [vmem:[#allocation2 + $0x8] sm:$0x2]  ;;  %v1865_v19 = vunpack.i.h.bf16 %v1863_v13  ;;  %v1864_v20 = vunpack.i.l.bf16 %v1863_v13  ;;  %vm2248_vm6 = vmor %vm816_vm4, %vm817_vm5 }
 0x184   : > { %519 = vst [vmem:[#allocation2 + $0x10] sm:$0x1] %v518_v16  ;;  %461 = vst [vmem:[#allocation2 + $0x8] sm:$0x1] %v460_v17  ;;  %v447_v22 = vpop.permute.xlu1 %446  ;;  %v2265_v56 = vsel %vm2248_vm6, %v827_v43, %v831_v44  ;;  %v1877_v16 = vld [vmem:[#allocation6 + $0x30] sm:$0xff]   ;;  %v2280_v24 = vshll.u32 %v812_v62, 16 }
 0x185   : > { %v529_v25 = vld [vmem:[#allocation2 + $0x10] sm:$0x2]  ;;  %v472_v26 = vsel %vm2207_vm12, %v1864_v20, %v471_v18  ;;  %v453_v27 = vsel %vm2217_vm1, %v447_v22, %v452_v15  ;;  %v897_v43 = vrot.slane %v896_v14, 2 }
 0x186   : > { %v530_v30 = vsel %vm2207_vm12, %v1865_v19, %v529_v25  ;;  %473 = vst [vmem:[#allocation2 + $0x8] sm:$0x2] %v472_v26  ;;  %454 = vst [vmem:[#allocation2 + $0x4] sm:$0x4] %v453_v27  ;;  %v475_v31 = vpop.permute.xlu0 %474  ;;  %vm1176_vm12 = vcmask 1046534  }
 0x187   : > { %531 = vst [vmem:[#allocation2 + $0x10] sm:$0x2] %v530_v30  ;;  %v478_v34 = vsel %vm2217_vm1, %v475_v31, %v477_v23  ;;  %vm2332_vm15 = vmor %vm2316_vm14, %vm1176_vm12 }
 0x188   : > { %479 = vst [vmem:[#allocation2 + $0x8] sm:$0x4] %v478_v34  ;;  %v508_v35 = vpop.permute.xlu1 %507 }
 0x189   : > { %v511_v41 = vsel %vm2217_vm1, %v508_v35, %v510_v32  ;;  %v539_v42 = vld [vmem:[#allocation2 + $0x4] sm:$0x3] }
 0x18a   : > { %512 = vst [vmem:[#allocation2 + $0xc] sm:$0x4] %v511_v41  ;;  %v533_v46 = vpop.permute.xlu0 %532  ;;  %v621_v50 = vcombine.low %v538_v37, %v539_v42  ;;  %v541_v51 = vld [vmem:[#allocation2 + $0xc] sm:$0x3] }
 0x18b   : > { %v536_v49 = vsel %vm2217_vm1, %v533_v46, %v535_v36 }
 0x18c   : > { %537 = vst [vmem:[#allocation2 + $0x10] sm:$0x4] %v536_v49  ;;  %v629_v63 = vrot.slane %v621_v50, %v2255_v48  ;;  %v901_v50 = vrot.slane %v2280_v24, 7 }
 0x18d   : > { %v540_v54 = vld [vmem:[#allocation2 + $0x8] sm:$0x3]  ;;  %v1656_v55 = vld.sshfl [vmem:[#allocation2 + $0x4] sm:$0x13 pattern:$0x76325410] }
 0x18e   : > { %v622_v57 = vcombine.low %v540_v54, %v541_v51  ;;  %v542_v58 = vld [vmem:[#allocation2 + $0x10] sm:$0x3]  ;;  %v553_v60 = vcombine.low %v539_v42, %v540_v54  ;;  %v834_v61 = vshrl.u32 %v1656_v55, 16  ;;  %v780_v2 = vcombine.high %v1656_v55, %v1656_v55 }
 0x18f   : > { %v554_v0 = vcombine.low %v541_v51, %v542_v58  ;;  %v1657_v1 = vld.sshfl [vmem:[#allocation2 + $0x8] sm:$0x13 pattern:$0x76325410]  ;;  %v837_v3 = vshll.u32 %v1656_v55, 16  ;;  %v692_v10 = vcombine.low %v542_v58, %v543_v59 }
 0x190   : > { %v2273_v4 = vrot.slane %v622_v57, %v2255_v48  ;;  %v561_v5 = vrot.slane %v553_v60, %v2255_v48  ;;  %v788_v7 = vcombine.high %v1657_v1, %v1657_v1  ;;  %v836_v8 = vrot.slane %v834_v61, 6  ;;  %v2285_v33 = vld.sshfl [vmem:[#allocation2 + $0x4] sm:$0x12 pattern:$0x76325410]  ;;  %v1879_v58 = vld [vmem:[#allocation6 + $0x20] sm:$0xff]  }
 0x191   : > { %v568_v9 = vrot.slane %v554_v0, %v2255_v48  ;;  %v1658_v12 = vld.sshfl [vmem:[#allocation2 + $0xc] sm:$0x13 pattern:$0x76325410]  ;;  %v839_v13 = vrot.slane %v837_v3, 7  ;;  %v848_v18 = vshrl.u32 %v1657_v1, 16  ;;  %v699_v29 = vrot.slane %v692_v10, %v2255_v48 }
 0x192   : > { %v637_v15 = vcombine.low %v629_v63, %v2273_v4  ;;  %v796_v17 = vcombine.high %v1658_v12, %v1658_v12  ;;  %v851_v19 = vshll.u32 %v1657_v1, 16  ;;  %v843_v22 = vshll.u32 %v780_v2, 16  ;;  %v2289_v38 = vld.sshfl [vmem:[#allocation2 + $0x8] sm:$0x12 pattern:$0x76325410] }
 0x193   : > { %v569_v20 = vcombine.low %v561_v5, %v568_v9  ;;  %v840_v21 = vor.u32 %v839_v13, %v836_v8  ;;  %v1659_v23 = vld.sshfl [vmem:[#allocation2 + $0x10] sm:$0x13 pattern:$0x76325410]  ;;  %v850_v25 = vrot.slane %v848_v18, 6  ;;  %v857_v27 = vshll.u32 %v788_v7, 16 }
 0x194   : > { %1724 = vmatmul.mubr.msk.bf16.vlgmr.msra.gmra.mxu0 %vm353_vm0, %v637_v15  ;;  %v853_v26 = vrot.slane %v851_v19, 7  ;;  %v862_v28 = vshrl.u32 %v1658_v12, 16  ;;  %v865_v31 = vshll.u32 %v1658_v12, 16  ;;  %v804_v32 = vcombine.high %v1659_v23, %v1659_v23 }
 0x195   : > { %1718 = vmatmul.mubr.msk.bf16.vlgmr.msra.gmra.mxu1 %vm353_vm0, %v569_v20  ;;  %1734 = vmatpush3.bf16.msra.mxu0 %v1878_v11  ;;  %v841_v30 = vrot.slane %v840_v21, 2  ;;  %v871_v36 = vshll.u32 %v796_v17, 16  ;;  %v876_v37 = vshrl.u32 %v1659_v23, 16  ;;  %v845_v40 = vrot.slane %v843_v22, 7  ;;  %v1880_v22 = vld [vmem:[#allocation6 + $0x38] sm:$0xff]  }
 0x196   : > { %1728 = vmatpush3.bf16.msra.mxu1 %v1877_v16  ;;  %1729 = vmatprep.mubr.msk.bf16.mxu1 %vm2022_vm7, %v2020_v39  ;;  %v854_v34 = vor.u32 %v853_v26, %v850_v25  ;;  %v864_v35 = vrot.slane %v862_v28, 6  ;;  %v867_v41 = vrot.slane %v865_v31, 7  ;;  %v879_v42 = vshll.u32 %v1659_v23, 16 }
 0x197   : > { %1739 = vmatprep.subr.bf16.mxu1 %v2020_v39  ;;  %1735 = vmatprep.mubr.msk.bf16.mxu0 %vm2022_vm7, %v2020_v39  ;;  %v859_v46 = vrot.slane %v857_v27, 7  ;;  %v878_v49 = vrot.slane %v876_v37, 6  ;;  %v846_v51 = vsel %vm2248_vm6, %v841_v30, %v845_v40  ;;  %v885_v54 = vshll.u32 %v804_v32, 16  ;;  %v1881_v30 = vld [vmem:[#allocation6 + $0x10] sm:$0xff]  }
 0x198   : > { %v855_v44 = vrot.slane %v854_v34, 2  ;;  %1745 = vmatprep.subr.bf16.mxu0 %v2020_v39  ;;  %v868_v52 = vor.u32 %v867_v41, %v864_v35  ;;  %v881_v53 = vrot.slane %v879_v42, 7  ;;  %v1670_v55 = vld.sshfl [vmem:[#allocation2 + $0xc] sm:$0x12 pattern:$0x76325410]  ;;  %v700_v57 = vcombine.low %v2273_v4, %v699_v29 }
 0x199   : > { %v873_v59 = vrot.slane %v871_v36, 7  ;;  %v1138_v60 = vcombine.high %v2285_v33, %v2285_v33  ;;  %v1154_v61 = vcombine.high %v1670_v55, %v1670_v55  ;;  %v1146_v1 = vcombine.high %v2289_v38, %v2289_v38  ;;  %v1671_v5 = vld.sshfl [vmem:[#allocation2 + $0x10] sm:$0x12 pattern:$0x76325410] }
 0x19a   : > { %v860_v62 = vsel %vm2248_vm6, %v855_v44, %v859_v46  ;;  %v869_v63 = vrot.slane %v868_v52, 2  ;;  %v882_v0 = vor.u32 %v881_v53, %v878_v49  ;;  %v906_v2 = vcombine.low %v2265_v56, %v846_v51  ;;  %v1672_v13 = vld.sshfl [vmem:[#allocation2 + $0x14] sm:$0x12 pattern:$0x76325410]  ;;  %v1883_v53 = vld [vmem:[#allocation6 + $0x40] sm:$0xff]  }
 0x19b   : > { %v1673_v3 = vrot.slane %v2252_v47, 9  ;;  %v1180_v4 = vrot.slane %v1130_v6, 7  ;;  %v887_v9 = vrot.slane %v885_v54, 7  ;;  %v1192_v56 = vrot.slane %v1154_v61, 7  ;;  %v1882_v46 = vld [vmem:[#allocation6 + $0x28] sm:$0xff]  }
 0x19c   : > { %v874_v7 = vsel %vm2248_vm6, %v869_v63, %v873_v59  ;;  %v883_v8 = vrot.slane %v882_v0, 2  ;;  %v978_v47 = vcombine.low %v846_v51, %v860_v62  ;;  %v902_v6 = vsel %vm2248_vm6, %v897_v43, %v901_v50 }
 0x19d   : > { %1730 = vmatmul.mubr.msk.bf16.vlgmr.msra.gmra.mxu1 %vm353_vm0, %v700_v57  ;;  %v907_v11 = vcombine.low %v860_v62, %v874_v7  ;;  %v1184_v12 = vrot.slane %v1138_v60, 7  ;;  %v1188_v15 = vrot.slane %v1146_v1, 7  ;;  %v1676_v16 = vrot.slane %v1670_v55, 9 }
 0x19e   : > { %1740 = vmatpush3.bf16.msra.mxu1 %v1879_v58  ;;  %1741 = vmatprep.mubr.msk.bf16.mxu1 %vm2022_vm7, %v2020_v39  ;;  %v888_v14 = vsel %vm2248_vm6, %v883_v8, %v887_v9  ;;  %v1162_v17 = vcombine.high %v1671_v5, %v1671_v5  ;;  %v914_v18 = vrot.slane %v906_v2, %v2255_v48  ;;  %v1674_v45 = vrot.slane %v2285_v33, 9 }
 0x19f   : > { %1751 = vmatprep.subr.bf16.mxu1 %v2020_v39  ;;  %v921_v19 = vrot.slane %v907_v11, %v2255_v48  ;;  %v979_v20 = vcombine.low %v874_v7, %v888_v14  ;;  %v1675_v23 = vrot.slane %v2289_v38, 9  ;;  %v1193_v24 = vsel %vm2332_vm15, %v1676_v16, %v1192_v56 }
 0x1a0   : > { %v1170_v25 = vcombine.high %v1672_v13, %v1672_v13  ;;  %v986_v27 = vrot.slane %v978_v47, %v2255_v48  ;;  %v1050_v29 = vcombine.low %v888_v14, %v902_v6  ;;  %v1181_v31 = vsel %vm2332_vm15, %v1673_v3, %v1180_v4 }
 0x1a1   : > { %v922_v26 = vcombine.low %v914_v18, %v921_v19  ;;  %v993_v28 = vrot.slane %v979_v20, %v2255_v48  ;;  %v1185_v32 = vsel %vm2332_vm15, %v1674_v45, %v1184_v12  ;;  %v1189_v33 = vsel %vm2332_vm15, %v1675_v23, %v1188_v15 }
 0x1a2   : > { %v1196_v34 = vrot.slane %v1162_v17, 7  ;;  %v1206_v36 = vcombine.low %v1189_v33, %v1193_v24  ;;  %v1677_v37 = vrot.slane %v1671_v5, 9  ;;  %v1678_v38 = vrot.slane %v1672_v13, 9 }
 0x1a3   : > { %1736 = vmatmul.mubr.msk.bf16.vlgmr.msra.gmra.mxu0 %vm353_vm0, %v922_v26  ;;  %v994_v35 = vcombine.low %v986_v27, %v993_v28  ;;  %v1200_v40 = vrot.slane %v1170_v25, 7  ;;  %v1057_v41 = vrot.slane %v1050_v29, %v2255_v48  ;;  %v1205_v42 = vcombine.low %v1181_v31, %v1185_v32 }
 0x1a4   : > { %1746 = vmatpush3.bf16.msra.mxu0 %v1880_v22  ;;  %1747 = vmatprep.mubr.msk.bf16.mxu0 %vm2022_vm7, %v2020_v39  ;;  %v1197_v43 = vsel %vm2332_vm15, %v1677_v37, %v1196_v34  ;;  %v1220_v44 = vrot.slane %v1206_v36, %v2255_v48  ;;  %v1277_v55 = vcombine.low %v1185_v32, %v1189_v33  ;;  %v1685_v37 = vld [vmem:[%s2456_s4] ss:$0 sm:$0xff] }
 0x1a5   : > { %1742 = vmatmul.mubr.msk.bf16.vlgmr.msra.gmra.mxu1 %vm353_vm0, %v994_v35  ;;  %1757 = vmatprep.subr.bf16.mxu0 %v2020_v39  ;;  %v1201_v49 = vsel %vm2332_vm15, %v1678_v38, %v1200_v40  ;;  %v1058_v50 = vcombine.low %v921_v19, %v1057_v41  ;;  %v1213_v51 = vrot.slane %v1205_v42, %v2255_v48 }
 0x1a6   : > { %1752 = vmatpush3.bf16.msra.mxu1 %v1881_v30  ;;  %1753 = vmatprep.mubr.msk.bf16.mxu1 %vm2022_vm7, %v2020_v39  ;;  %v1278_v52 = vcombine.low %v1193_v24, %v1197_v43  ;;  %v1349_v57 = vcombine.low %v1197_v43, %v1201_v49  ;;  %v1285_v59 = vrot.slane %v1277_v55, %v2255_v48 }
 0x1a7   : > { %1763 = vmatprep.subr.bf16.mxu1 %v2020_v39  ;;  %v1221_v54 = vcombine.low %v1213_v51, %v1220_v44 }
 0x1a8   : > { %v1292_v58 = vrot.slane %v1278_v52, %v2255_v48  ;;  %v1356_v60 = vrot.slane %v1349_v57, %v2255_v48 }
 0x1aa   : > { %v1293_v61 = vcombine.low %v1285_v59, %v1292_v58  ;;  %v1357_v62 = vcombine.low %v1220_v44, %v1356_v60 }
 0x1ab   : > { %1748 = vmatmul.mubr.msk.bf16.vlgmr.msra.gmra.mxu0 %vm353_vm0, %v1058_v50 }
 0x1ac   : > { %1758 = vmatpush3.bf16.msra.mxu0 %v1882_v46  ;;  %1759 = vmatprep.mubr.msk.bf16.mxu0 %vm2022_vm7, %v2020_v39 }
 0x1ad   : > { %1754 = vmatmul.mubr.msk.bf16.vlgmr.msra.gmra.mxu1 %vm353_vm0, %v1221_v54  ;;  %1769 = vmatprep.subr.bf16.mxu0 %v2020_v39 }
 0x1ae   : > { %1764 = vmatpush3.bf16.msra.mxu1 %v1883_v53  ;;  %1765 = vmatprep.mubr.msk.bf16.mxu1 %vm2022_vm7, %v2020_v39 }
 0x1b3   : > { %1760 = vmatmul.mubr.msk.bf16.vlgmr.msra.gmra.mxu0 %vm353_vm0, %v1293_v61 }
 0x1b4   : > { %1771 = vmatprep.mubr.msk.bf16.mxu0 %vm2022_vm7, %v2020_v39 }
 0x1b5   : > { %1766 = vmatmul.mubr.msk.bf16.vlgmr.msra.gmra.mxu1 %vm353_vm0, %v1357_v62  ;;  %v1459_v62 = vld [vmem:[%s2458_s6] sm:$0x7] }
 0x254   : > { %v681_v63 = vpop.f32.mrf.mxu0 }
 0x255   : > { %v613_v0 = vpop.f32.mrf.mxu1 }
 0x256   : > { %v1725_v1 = vpop.f32.mrf.mxu0  ;;  %v682_v39 = vadd.f32 %v681_v63, %v613_v0 }
 0x257   : > { %v1719_v2 = vpop.f32.mrf.mxu1 }
 0x258   : > { %v684_v3 = vpop.f32.mrf.mxu0 }
 0x259   : > { %v616_v4 = vpop.f32.mrf.mxu1 }
 0x25a   : > { %v1726_v5 = vpop.f32.mrf.mxu0  ;;  %v685_v18 = vadd.f32 %v684_v3, %v616_v4 }
 0x25b   : > { %v1720_v7 = vpop.f32.mrf.mxu1 }
 0x25d   : > { %v744_v8 = vpop.f32.mrf.mxu1 }
 0x25e   : > { %v751_v15 = vadd.f32 %v744_v8, %v682_v39 }
 0x25f   : > { %v1731_v9 = vpop.f32.mrf.mxu1 }
 0x261   : > { %v747_v48 = vpop.f32.mrf.mxu1 }
 0x262   : > { %v752_v22 = vadd.f32 %v747_v48, %v685_v18 }
 0x263   : > { %v1732_v10 = vpop.f32.mrf.mxu1  ;;  %v966_v56 = vpop.f32.mrf.mxu0 }
 0x264   : > { %v973_v19 = vadd.f32 %v966_v56, %v751_v15 }
 0x265   : > { %v1737_v11 = vpop.f32.mrf.mxu0  ;;  %v1038_v47 = vpop.f32.mrf.mxu1 }
 0x266   : > { %v1045_v45 = vadd.f32 %v1038_v47, %v973_v19 }
 0x267   : > { %v969_v6 = vpop.f32.mrf.mxu0  ;;  %v1743_v12 = vpop.f32.mrf.mxu1 }
 0x268   : > { %v974_v25 = vadd.f32 %v969_v6, %v752_v22 }
 0x269   : > { %v1738_v13 = vpop.f32.mrf.mxu0  ;;  %v1041_v14 = vpop.f32.mrf.mxu1 }
 0x26a   : > { %v1046_v29 = vadd.f32 %v1041_v14, %v974_v25  ;;  %v1457_v13 = vld [vmem:[%s2457_s5] sm:$0x3] }
 0x26b   : > { %v1102_v16 = vpop.f32.mrf.mxu0  ;;  %v1744_v17 = vpop.f32.mrf.mxu1 }
 0x26c   : > { %v1109_v26 = vadd.f32 %v1102_v16, %v1045_v45 }
 0x26d   : > { %v1749_v20 = vpop.f32.mrf.mxu0  ;;  %v1265_v21 = vpop.f32.mrf.mxu1 }
 0x26e   : > { %v1272_v30 = vadd.f32 %v1265_v21, %v1109_v26 }
 0x26f   : > { %v1105_v23 = vpop.f32.mrf.mxu0  ;;  %v1755_v24 = vpop.f32.mrf.mxu1 }
 0x270   : > { %v1110_v33 = vadd.f32 %v1105_v23, %v1046_v29 }
 0x271   : > { %v1750_v27 = vpop.f32.mrf.mxu0  ;;  %v1268_v28 = vpop.f32.mrf.mxu1 }
 0x272   : > { %v1273_v38 = vadd.f32 %v1268_v28, %v1110_v33 }
 0x273   : > { %v1337_v31 = vpop.f32.mrf.mxu0  ;;  %v1756_v32 = vpop.f32.mrf.mxu1 }
 0x274   : > { %v1344_v34 = vadd.f32 %v1337_v31, %v1272_v30 }
 0x275   : > { %v1761_v35 = vpop.f32.mrf.mxu0  ;;  %v1401_v36 = vpop.f32.mrf.mxu1 }
 0x276   : > { %v1408_v40 = vadd.f32 %v1401_v36, %v1344_v34 }
 0x277   : > { %v1340_v41 = vpop.f32.mrf.mxu0  ;;  %v1767_v42 = vpop.f32.mrf.mxu1 }
 0x278   : > { %v1345_v43 = vadd.f32 %v1340_v41, %v1273_v38  ;;  %v1417_v44 = vadd.f32 %v1685_v37, %v1408_v40 }
 0x279   : > { %v1762_v46 = vpop.f32.mrf.mxu0  ;;  %v1404_v49 = vpop.f32.mrf.mxu1 }
 0x27a   : > { %v1421_v50 = vmul.f32 0.2, %v1417_v44  ;;  %v1409_v51 = vadd.f32 %v1404_v49, %v1345_v43  ;;  %vm1419_vm7 = vcmp.ge.f32.partialorder %v1417_v44, 0.0 }
 0x27b   : > { %v1768_v52 = vpop.f32.mrf.mxu1 }
 0x27c   : > { %v1418_v53 = vadd.f32 %v1685_v37, %v1409_v51  ;;  %v1423_v54 = vsel %vm1419_vm7, %v1417_v44, %v1421_v50 }
 0x27d   : > { %v1425_v55 = vmul.f32 %v1423_v54, %v1423_v54 }
 0x27e   : > { %v1422_v57 = vmul.f32 0.2, %v1418_v53  ;;  %vm1420_vm1 = vcmp.ge.f32.partialorder %v1418_v53, 0.0 }
 0x27f   : > { %v1427_v58 = vsel %vm353_vm0, %v1425_v55, 0.0 }
 0x280   : > { %1428 = vadd.xlane.f32.xlu1 %v1427_v58  ;;  %v1424_v59 = vsel %vm1420_vm1, %v1418_v53, %v1422_v57 }
 0x281   : > { %v1426_v60 = vmul.f32 %v1424_v59, %v1424_v59 }
 0x283   : > { %v1430_v61 = vsel %vm353_vm0, %v1426_v60, 0.0 }
 0x284   : > { %1431 = vadd.xlane.f32.xlu0 %v1430_v61 }
 0x29a   : > { %1462 = vperm.xlu0 %1866, %v1459_v62  }
 0x309   : > { %v1429_v63 = vpop.xlane.xlu1 %1428 }
 0x30a   : > { %v1434_v0 = vmul.f32 0.0625, %v1429_v63 }
 0x30c   : > { %v1436_v1 = vadd.f32 1e-08, %v1434_v0 }
 0x30d   : > { %v1432_v2 = vpop.xlane.xlu0 %1431 }
 0x30e   : > { %1884 = vrsqrt.f32 %v1436_v1  ;;  %v1435_v3 = vmul.f32 0.0625, %v1432_v2 }
 0x310   : > { %v1437_v4 = vadd.f32 1e-08, %v1435_v3 }
 0x312   : > { %1886 = vrsqrt.f32 %v1437_v4 }
 0x31b   : > { %v1885_v5 = vpop.eup %1884 }
 0x31c   : > { %v1440_v7 = vmul.f32 %v1885_v5, %v1423_v54 }
 0x31e   : > { %v1444_v8 = vcombine.high %v1440_v7, %v1440_v7  ;;  %v1448_v9 = vpack.c.bf16 %v1440_v7, %v1440_v7 }
 0x31f   : > { %v1887_v48 = vpop.eup %1886 }
 0x320   : > { %v1441_v10 = vmul.f32 %v1887_v48, %v1424_v59  ;;  %v1449_v56 = vpack.c.bf16 %v1444_v8, %v1444_v8  ;;  %1453 = vst.msk [vmem:[%s314_s25] sm:$0x3] %vm1452_vm2, %v1448_v9 }
 0x322   : > { %v1445_v11 = vcombine.high %v1441_v10, %v1441_v10  ;;  %v1450_v47 = vpack.c.bf16 %v1441_v10, %v1441_v10  ;;  %v1458_v6 = vpack.c.bf16 %v1441_v10, %v1440_v7  ;;  %1454 = vst.msk [vmem:[%s314_s25 + $0x2] sm:$0x3] %vm1452_vm2, %v1449_v56 }
 0x324   : > { %v1451_v12 = vpack.c.bf16 %v1445_v11, %v1445_v11  ;;  %v1469_v39 = vsel %vm353_vm0, %v1458_v6, 0  ;;  %1455 = vst.msk [vmem:[%s314_s25 + $0x4] sm:$0x3] %vm1452_vm2, %v1450_v47 }
 0x325   : > { %1770 = vmatpush3.bf16.xpose.msra.mxu0 %v1469_v39 }
 0x326   : > { %1456 = vst.msk [vmem:[%s314_s25 + $0x6] sm:$0x3] %vm1452_vm2, %v1451_v12 }
 0x32c   : > { %1772 = vmatmul.mubr.msk.bf16.vlgmr.msra.gmra.mxu0 %vm353_vm0, %v1457_v13 }
 0x32d   : > { %1953 = shalt.err (!%p1950_p1)
}
 0x32e   : > { %s1954_s22 = scalar_lea.hbm %s2399_s23, 128  ;;  %s1958_s18 = scalar_lea.hbm %s2459_s7, 256 }
 0x32f   : > { %p1955_p3 = scmp.ne.s32.totalorder %s2399_s23, %s1954_s22  ;;  %p1959_p13 = scmp.lt.s32.totalorder %s2399_s23, %s2459_s7 }
 0x330   : > { %p1960_p6 = scmp.lt.s32.totalorder %s1958_s18, %s1954_s22 }
 0x331   : > { %p1956_p2 = pnand %p1955_p3, %p2112_p5 }
 0x332   : > { %p1961_p9 = por %p1960_p6, %p1959_p13 }
 0x333   : > { %p1957_p4 = pneg %p1956_p2 }
 0x335   : > { %p1962_p10 = pnand %p1961_p9, %p1957_p4 }
 0x337   : > { %1965 = shalt.err (!%p1962_p10)
}
 0x338   : > { %s2028_s17 = smov 2   ;;  %p321_p12 = scmp.lt.s32.totalorder %s2095_s9, 1  ;;  %v1463_v14 = vpop.permute.xlu0 %1462  ;;  %vm1513_vm0 = vmand %vm1452_vm2, %vm431_vm9 }
 0x339   : > { %1783 = dma.vmem_to_hbm [thread:$0]  (%p2112_p5), %s2401_s19, 128, %s2399_s23, %s2403_s20, %s2023_s13, %s2023_s13, %s2028_s17  }
 0x33a   : > { %s2492_s9 = smov (!%p321_p12, %s2095_s9), 1 }
 0x33b   : > { %s1643_s26 = sshll.u32 %s2492_s9, 1 }
 0x33c   : > { %s324_s25 = scalar_lea.vmem %s2460_s8, %s1643_s26 }
 0x33d   : > { %v1514_v17 = vld [vmem:[%s324_s25] sm:$0x3] }
 0x3ec   : > { %v1505_v15 = vpop.f32.mrf.mxu0 }
 0x3ed   : > { %v1506_v16 = vadd.f32 %v1505_v15, %v1463_v14 }
 0x3ee   : > { %v1773_v18 = vpop.f32.mrf.mxu0 }
 0x3ef   : > { %v1511_v19 = vpack.c.bf16 %v1506_v16, %v1506_v16 }
 0x3f0   : > { %v1508_v20 = vpop.f32.mrf.mxu0 }
 0x3f1   : > { %v1515_v21 = vsel %vm1513_vm0, %v1511_v19, %v1514_v17 }
 0x3f2   : > { %1516 = vst [vmem:[%s324_s25] sm:$0x3] %v1515_v21  ;;  %v1774_v22 = vpop.f32.mrf.mxu0 }
 0x3f3 PF: > { %p1800_p5 = scmp.ge.s32.totalorder %s2008_s30, 2  ;;  %s1553_s9 = sand.u32 1, %s1996_s27  }
 0x3f4   : > { %p2486_p7 = scmp.ne.s32.totalorder %s2463_s16, 0  ;;  %s1554_s15 = scalar_lea.sflag [#allocation5], %s1553_s9 }
 0x3f6   : > { %p1793_p8 = pnand %p1800_p5, %p2486_p7 }
 0x3f8   : > { %p1794_p11 = pneg %p1793_p8 }
 0x3fa   : > { %1991 = dma.done.wait (%p1794_p11), %s1554_s15, 128  }
 0x3fb   : > { %1993 = vsyncadd (%p1794_p11), %s1554_s15, 4294967168  ;;  %p21_p0 = scmp.ge.s32.totalorder %s2099_s11, 4   ;;  %s2487_s27 = smov %s2000_s28 }
 0x3fc   : > { %s2488_s28 = smov %s2004_s29  ;;  %s2489_s29 = smov %s2110_s14 }
 0x3fd   : > { %s2490_s30 = smov %s2099_s11  ;;  %23 = sbr.rel (!%p21_p0) target bundleno = 5 (0x5), region = 114 }
 0x402   :  { %1566 = vsyncpa [#allocation4], 1 }
 0x403   :  { %1568 = vsyncpa [#allocation4 + $0x1], 1 }
 0x404   :  { %1569 = vsyncpa [#allocation7], 1 }
 0x405   :  { %1570 = vsyncpa [#allocation5], 1 }
 0x406   :  { %1572 = vsyncpa [#allocation5 + $0x1], 1 }

</bundles_post_ra>
